<compile_context>
chip_gen: v5e
topology: v5e:2x2
jax: 0.10.0
libtpu: 0.0.40
codegen_flags: <defaults>
</compile_context>

<pallas_src>
import math

import jax
import jax.numpy as jnp
from jax.experimental import pallas as pl
from jax.experimental.pallas import tpu as pltpu


# ----------------------------- in-kernel helpers -----------------------------

def _gelu(x):
    # tanh-approx GELU (torch F.gelu(approximate='tanh')); tanh lands on the EUP.
    c = 0.7978845608028654  # sqrt(2/pi)
    return 0.5 * x * (1.0 + jnp.tanh(c * (x + 0.044715 * x * x * x)))


def _dconv3(x, w_ref, b_ref, blk, d):
    """Dilated k=3 'same' conv on a (T, Cpad) f32 tile.

    out[t] = x[t-d] @ W0 + x[t] @ W1 + x[t+d] @ W2 + b   (zero padded in time)

    x:     (T, Cpad) f32 value
    w_ref: (NB, 3, Cpad, Cpad) bf16 ref
    b_ref: (NB, 1, Cpad) f32 ref
    blk:   static block index, d: static dilation
    """
    T = x.shape[0]
    y = jnp.dot(x.astype(jnp.bfloat16), w_ref[blk, 1],
                preferred_element_type=jnp.float32)
    if d < T:  # if d >= T both shifted taps are entirely zero -> skip them.
        row = jax.lax.broadcasted_iota(jnp.int32, x.shape, 0)
        # x[t-d]: rotate down by d, zero the first d (wrapped) rows.
        x_prev = jnp.where(row >= d, pltpu.roll(x, shift=d, axis=0), 0.0)
        # x[t+d]: rotate up by d (== rotate down by T-d), zero the last d rows.
        x_next = jnp.where(row < T - d, pltpu.roll(x, shift=T - d, axis=0), 0.0)
        y = y + jnp.dot(x_prev.astype(jnp.bfloat16), w_ref[blk, 0],
                        preferred_element_type=jnp.float32)
        y = y + jnp.dot(x_next.astype(jnp.bfloat16), w_ref[blk, 2],
                        preferred_element_type=jnp.float32)
    return y + b_ref[blk]


def _make_fused_kernel(dilations, has_proj):
    """Builds the fused encoder kernel (all shapes / dilations are static)."""
    nb = len(dilations)

    def kernel(x_ref, m_ref, inw_ref, inb_ref,
               w1_ref, b1_ref, w2_ref, b2_ref, pw_ref, pb_ref, o_ref):
        xv = x_ref[0]                       # (T, D)
        mv = m_ref[0]                       # (T, D)
        xv = jnp.where(jnp.isnan(xv), 0.0, xv)
        mv = jnp.where(jnp.isnan(mv), 0.0, mv)
        xm = (xv * mv).astype(jnp.bfloat16)

        # input_fc : (T, D) @ (D, Cpad) -> (T, Cpad), f32 accumulate
        h = jnp.dot(xm, inw_ref[...], preferred_element_type=jnp.float32)
        h = h + inb_ref[...]

        # DilatedConvEncoder: activation h stays resident across all blocks.
        for i in range(nb):
            d = dilations[i]
            if has_proj[i]:
                res = jnp.dot(h.astype(jnp.bfloat16), pw_ref[i],
                              preferred_element_type=jnp.float32) + pb_ref[i]
            else:
                res = h
            g = _gelu(h)
            c1 = _dconv3(g, w1_ref, b1_ref, i, d)
            g2 = _gelu(c1)
            c2 = _dconv3(g2, w2_ref, b2_ref, i, d)
            h = c2 + res

        # Lane-dense (Cpad = 128-multiple) store; real channels sliced outside.
        o_ref[0] = h.astype(o_ref.dtype)

    return kernel


# ------------------------------- pallas wrapper -------------------------------

def ts_encoder_forward(x_full, packed):
    """Eval-mode forward of TSEncoder_f_tUrl. x_full: (B, T, 2*input_dims + 1)."""
    B, T, dtot = x_full.shape
    half = dtot // 2
    m = x_full[..., -half:]
    xpart = x_full[..., :-half]
    # t = xpart[..., -1] is computed then unused in the reference forward.
    x = xpart[..., :-1]

    D = packed["D"]
    O = packed["O"]
    Cpad = packed["Cpad"]
    nb = len(packed["dilations"])

    kernel = _make_fused_kernel(packed["dilations"], packed["has_proj"])

    out = pl.pallas_call(
        kernel,
        out_shape=jax.ShapeDtypeStruct((B, T, Cpad), jnp.float32),
        grid=(B,),
        in_specs=[
            pl.BlockSpec((1, T, D), lambda b: (b, 0, 0)),          # x
            pl.BlockSpec((1, T, D), lambda b: (b, 0, 0)),          # m
            pl.BlockSpec((D, Cpad), lambda b: (0, 0)),             # input_fc W
            pl.BlockSpec((1, Cpad), lambda b: (0, 0)),             # input_fc b
            pl.BlockSpec((nb, 3, Cpad, Cpad), lambda b: (0, 0, 0, 0)),  # conv1 W
            pl.BlockSpec((nb, 1, Cpad), lambda b: (0, 0, 0)),           # conv1 b
            pl.BlockSpec((nb, 3, Cpad, Cpad), lambda b: (0, 0, 0, 0)),  # conv2 W
            pl.BlockSpec((nb, 1, Cpad), lambda b: (0, 0, 0)),           # conv2 b
            pl.BlockSpec((nb, Cpad, Cpad), lambda b: (0, 0, 0)),        # proj W
            pl.BlockSpec((nb, 1, Cpad), lambda b: (0, 0, 0)),           # proj b
        ],
        out_specs=pl.BlockSpec((1, T, Cpad), lambda b: (b, 0, 0)),
        compiler_params=pltpu.CompilerParams(
            dimension_semantics=("parallel",),   # shards batch across v7x's 2 TCs
            vmem_limit_bytes=32 * 1024 * 1024,   # explicit; safe on v5e/v6e/v7x
        ),
    )(x, m, packed["in_w"], packed["in_b"],
      packed["w1"], packed["b1"], packed["w2"], packed["b2"],
      packed["pw"], packed["pb"])

    # repr_dropout(p=0.1) is identity in eval mode.
    return out[..., :O]


# ------------------------------- parameters ----------------------------------

def init_params(key, input_dims, output_dims, hidden_dims, depth):
    """Deterministic synthetic params, PyTorch-default-style uniform(+-1/sqrt(fan_in))."""
    def uni(k, shape, fan_in):
        bnd = 1.0 / math.sqrt(fan_in)
        return jax.random.uniform(k, shape, jnp.float32, -bnd, bnd)

    channels = [hidden_dims] * depth + [output_dims]
    nb = len(channels)
    keys = jax.random.split(key, 2 + 6 * nb)
    ki = iter(keys)
    params = {
        "in_w": uni(next(ki), (input_dims, hidden_dims), input_dims),  # Linear W^T
        "in_b": uni(next(ki), (hidden_dims,), input_dims),
        "blocks": [],
    }
    in_ch = hidden_dims
    for i, out_ch in enumerate(channels):
        final = (i == nb - 1)
        blk = {
            "w1": uni(next(ki), (3, in_ch, out_ch), in_ch * 3),
            "b1": uni(next(ki), (out_ch,), in_ch * 3),
            "w2": uni(next(ki), (3, out_ch, out_ch), out_ch * 3),
            "b2": uni(next(ki), (out_ch,), out_ch * 3),
            "dilation": 2 ** i,
            "has_proj": (in_ch != out_ch) or final,   # ConvBlock 1x1 projector
        }
        kpw, kpb = next(ki), next(ki)
        if blk["has_proj"]:
            blk["pw"] = uni(kpw, (in_ch, out_ch), in_ch)
            blk["pb"] = uni(kpb, (out_ch,), in_ch)
        params["blocks"].append(blk)
        in_ch = out_ch
    return params


def pack_params(params, input_dims, output_dims, hidden_dims, lane=128):
    """Pad all channel dims to a lane-dense multiple of 128, stack per-block
    weights along a leading block axis, and cast matmul weights to bf16."""
    cmax = max(hidden_dims, output_dims)
    Cpad = ((cmax + lane - 1) // lane) * lane
    blocks = params["blocks"]
    nb = len(blocks)

    in_w = jnp.zeros((input_dims, Cpad), jnp.float32)
    in_w = in_w.at[:, :hidden_dims].set(params["in_w"])
    in_b = jnp.zeros((1, Cpad), jnp.float32).at[0, :hidden_dims].set(params["in_b"])

    w1 = jnp.zeros((nb, 3, Cpad, Cpad), jnp.float32)
    w2 = jnp.zeros((nb, 3, Cpad, Cpad), jnp.float32)
    pw = jnp.zeros((nb, Cpad, Cpad), jnp.float32)
    b1 = jnp.zeros((nb, 1, Cpad), jnp.float32)
    b2 = jnp.zeros((nb, 1, Cpad), jnp.float32)
    pb = jnp.zeros((nb, 1, Cpad), jnp.float32)
    dilations, has_proj = [], []
    for i, blk in enumerate(blocks):
        cin, cout = blk["w1"].shape[1], blk["w1"].shape[2]
        w1 = w1.at[i, :, :cin, :cout].set(blk["w1"])
        b1 = b1.at[i, 0, :cout].set(blk["b1"])
        w2 = w2.at[i, :, :cout, :cout].set(blk["w2"])
        b2 = b2.at[i, 0, :cout].set(blk["b2"])
        if blk["has_proj"]:
            pw = pw.at[i, :cin, :cout].set(blk["pw"])
            pb = pb.at[i, 0, :cout].set(blk["pb"])
        dilations.append(blk["dilation"])
        has_proj.append(bool(blk["has_proj"]))

    return {
        "D": input_dims, "O": output_dims, "Cpad": Cpad,
        "dilations": tuple(dilations), "has_proj": tuple(has_proj),
        "in_w": in_w.astype(jnp.bfloat16), "in_b": in_b,
        "w1": w1.astype(jnp.bfloat16), "b1": b1,
        "w2": w2.astype(jnp.bfloat16), "b2": b2,
        "pw": pw.astype(jnp.bfloat16), "pb": pb,
    }


# ----------------------------------- main -------------------------------------

if __name__ == "__main__":
    input_dims, hidden_dims, output_dims, depth = 6, 32, 16, 3
    B, T = 2, 8

    key = jax.random.PRNGKey(0)
    kp, kx = jax.random.split(key)
    params = init_params(kp, input_dims, output_dims, hidden_dims, depth)
    packed = pack_params(params, input_dims, output_dims, hidden_dims)

    # input layout matches the module's slicing: [features(6) | t(1) | mask(6)]
    x = jax.random.normal(kx, (B, T, 2 * input_dims + 1), jnp.float32)

    out = ts_encoder_forward(x, packed)
    out = jax.block_until_ready(out)

    assert out.shape == (B, T, output_dims), out.shape
    assert not bool(jnp.any(jnp.isnan(out)))
    print("KERNEL_OK")
</pallas_src>

<mosaic_0001>
module attributes {stable_mosaic.version = 11 : i64} {
  func.func @kernel(%arg0: i32, %arg1: memref<1x8x6xf32, #tpu.memory_space<vmem>>, %arg2: memref<1x8x6xf32, #tpu.memory_space<vmem>>, %arg3: memref<6x128xbf16, #tpu.memory_space<vmem>>, %arg4: memref<1x128xf32, #tpu.memory_space<vmem>>, %arg5: memref<4x3x128x128xbf16, #tpu.memory_space<vmem>>, %arg6: memref<4x1x128xf32, #tpu.memory_space<vmem>>, %arg7: memref<4x3x128x128xbf16, #tpu.memory_space<vmem>>, %arg8: memref<4x1x128xf32, #tpu.memory_space<vmem>>, %arg9: memref<4x128x128xbf16, #tpu.memory_space<vmem>>, %arg10: memref<4x1x128xf32, #tpu.memory_space<vmem>>, %arg11: memref<1x8x128xf32, #tpu.memory_space<vmem>>) attributes {dimension_semantics = [#tpu.dimension_semantics<parallel>], iteration_bounds = array<i64: 2>, scalar_prefetch = 0 : i64, scratch_operands = 0 : i64, tpu.core_type = #tpu.core_type<tc>, window_params = [{transform_indices = @transform_0, window_bounds = array<i64: 1, 8, 6>}, {transform_indices = @transform_1, window_bounds = array<i64: 1, 8, 6>}, {pipeline_mode = #tpu.pipeline_mode<synchronous>, transform_indices = @transform_2, window_bounds = array<i64: 6, 128>}, {pipeline_mode = #tpu.pipeline_mode<synchronous>, transform_indices = @transform_3, window_bounds = array<i64: 1, 128>}, {pipeline_mode = #tpu.pipeline_mode<synchronous>, transform_indices = @transform_4, window_bounds = array<i64: 4, 3, 128, 128>}, {pipeline_mode = #tpu.pipeline_mode<synchronous>, transform_indices = @transform_5, window_bounds = array<i64: 4, 1, 128>}, {pipeline_mode = #tpu.pipeline_mode<synchronous>, transform_indices = @transform_6, window_bounds = array<i64: 4, 3, 128, 128>}, {pipeline_mode = #tpu.pipeline_mode<synchronous>, transform_indices = @transform_7, window_bounds = array<i64: 4, 1, 128>}, {pipeline_mode = #tpu.pipeline_mode<synchronous>, transform_indices = @transform_8, window_bounds = array<i64: 4, 128, 128>}, {pipeline_mode = #tpu.pipeline_mode<synchronous>, transform_indices = @transform_9, window_bounds = array<i64: 4, 1, 128>}, {transform_indices = @transform_10, window_bounds = array<i64: 1, 8, 128>}]} {
    %c0 = arith.constant 0 : index
    %c0_0 = arith.constant 0 : index
    %c0_1 = arith.constant 0 : index
    %0 = vector.load %arg1[%c0, %c0_0, %c0_1] : memref<1x8x6xf32, #tpu.memory_space<vmem>>, vector<1x8x6xf32>
    %1 = vector.shape_cast %0 : vector<1x8x6xf32> to vector<8x6xf32>
    %c0_2 = arith.constant 0 : index
    %c0_3 = arith.constant 0 : index
    %c0_4 = arith.constant 0 : index
    %2 = vector.load %arg2[%c0_2, %c0_3, %c0_4] : memref<1x8x6xf32, #tpu.memory_space<vmem>>, vector<1x8x6xf32>
    %3 = vector.shape_cast %2 : vector<1x8x6xf32> to vector<8x6xf32>
    %4 = arith.cmpf one, %1, %1 : vector<8x6xf32>
    %cst = arith.constant 0.000000e+00 : f32
    %5 = vector.broadcast %cst : f32 to vector<8x6xf32>
    %6 = arith.select %4, %5, %1 : vector<8x6xi1>, vector<8x6xf32>
    %7 = arith.cmpf one, %3, %3 : vector<8x6xf32>
    %cst_5 = arith.constant 0.000000e+00 : f32
    %8 = vector.broadcast %cst_5 : f32 to vector<8x6xf32>
    %9 = arith.select %7, %8, %3 : vector<8x6xi1>, vector<8x6xf32>
    %10 = arith.mulf %6, %9 : vector<8x6xf32>
    %11 = arith.truncf %10 : vector<8x6xf32> to vector<8x6xbf16>
    %c0_6 = arith.constant 0 : index
    %c0_7 = arith.constant 0 : index
    %12 = vector.load %arg3[%c0_6, %c0_7] : memref<6x128xbf16, #tpu.memory_space<vmem>>, vector<6x128xbf16>
    %cst_8 = arith.constant dense<0.000000e+00> : vector<8x128xf32>
    %13 = tpu.matmul %11, %12, %cst_8 {dimension_numbers = #tpu.dot_dimension_numbers<[1], [0], [0], [1], [0, 0, 1, 1], [], []>} : vector<8x6xbf16>, vector<6x128xbf16>, vector<8x128xf32> -> vector<8x128xf32>
    %c0_9 = arith.constant 0 : index
    %c0_10 = arith.constant 0 : index
    %14 = vector.load %arg4[%c0_9, %c0_10] : memref<1x128xf32, #tpu.memory_space<vmem>>, vector<1x128xf32>
    %15 = vector.broadcast %14 : vector<1x128xf32> to vector<8x128xf32>
    %16 = arith.addf %13, %15 : vector<8x128xf32>
    %cst_11 = arith.constant 5.000000e-01 : f32
    %17 = vector.broadcast %cst_11 : f32 to vector<8x128xf32>
    %18 = arith.mulf %17, %16 : vector<8x128xf32>
    %cst_12 = arith.constant 4.471500e-02 : f32
    %19 = vector.broadcast %cst_12 : f32 to vector<8x128xf32>
    %20 = arith.mulf %19, %16 : vector<8x128xf32>
    %21 = arith.mulf %20, %16 : vector<8x128xf32>
    %22 = arith.mulf %21, %16 : vector<8x128xf32>
    %23 = arith.addf %16, %22 : vector<8x128xf32>
    %cst_13 = arith.constant 0.797884583 : f32
    %24 = vector.broadcast %cst_13 : f32 to vector<8x128xf32>
    %25 = arith.mulf %24, %23 : vector<8x128xf32>
    %26 = math.tanh %25 : vector<8x128xf32>
    %cst_14 = arith.constant 1.000000e+00 : f32
    %27 = vector.broadcast %cst_14 : f32 to vector<8x128xf32>
    %28 = arith.addf %27, %26 : vector<8x128xf32>
    %29 = arith.mulf %18, %28 : vector<8x128xf32>
    %30 = arith.truncf %29 : vector<8x128xf32> to vector<8x128xbf16>
    %c0_15 = arith.constant 0 : index
    %c1 = arith.constant 1 : index
    %c0_16 = arith.constant 0 : index
    %c0_17 = arith.constant 0 : index
    %31 = vector.load %arg5[%c0_15, %c1, %c0_16, %c0_17] : memref<4x3x128x128xbf16, #tpu.memory_space<vmem>>, vector<1x1x128x128xbf16>
    %32 = vector.shape_cast %31 : vector<1x1x128x128xbf16> to vector<128x128xbf16>
    %cst_18 = arith.constant dense<0.000000e+00> : vector<8x128xf32>
    %33 = tpu.matmul %30, %32, %cst_18 {dimension_numbers = #tpu.dot_dimension_numbers<[1], [0], [0], [1], [0, 0, 1, 1], [], []>} : vector<8x128xbf16>, vector<128x128xbf16>, vector<8x128xf32> -> vector<8x128xf32>
    %34 = tpu.iota {dimensions = array<i32: 0>} : vector<8x128xi32>
    %c1_i32 = arith.constant 1 : i32
    %35 = vector.broadcast %c1_i32 : i32 to vector<8x128xi32>
    %36 = arith.cmpi sge, %34, %35 : vector<8x128xi32>
    %c1_i32_19 = arith.constant 1 : i32
    %37 = tpu.dynamic_rotate %29 by %c1_i32_19 dim 0 : vector<8x128xf32>, i32 -> vector<8x128xf32>
    %cst_20 = arith.constant 0.000000e+00 : f32
    %38 = vector.broadcast %cst_20 : f32 to vector<8x128xf32>
    %39 = arith.select %36, %37, %38 : vector<8x128xi1>, vector<8x128xf32>
    %c7_i32 = arith.constant 7 : i32
    %40 = vector.broadcast %c7_i32 : i32 to vector<8x128xi32>
    %41 = arith.cmpi slt, %34, %40 : vector<8x128xi32>
    %c7_i32_21 = arith.constant 7 : i32
    %42 = tpu.dynamic_rotate %29 by %c7_i32_21 dim 0 : vector<8x128xf32>, i32 -> vector<8x128xf32>
    %cst_22 = arith.constant 0.000000e+00 : f32
    %43 = vector.broadcast %cst_22 : f32 to vector<8x128xf32>
    %44 = arith.select %41, %42, %43 : vector<8x128xi1>, vector<8x128xf32>
    %45 = arith.truncf %39 : vector<8x128xf32> to vector<8x128xbf16>
    %c0_23 = arith.constant 0 : index
    %c0_24 = arith.constant 0 : index
    %c0_25 = arith.constant 0 : index
    %c0_26 = arith.constant 0 : index
    %46 = vector.load %arg5[%c0_23, %c0_24, %c0_25, %c0_26] : memref<4x3x128x128xbf16, #tpu.memory_space<vmem>>, vector<1x1x128x128xbf16>
    %47 = vector.shape_cast %46 : vector<1x1x128x128xbf16> to vector<128x128xbf16>
    %cst_27 = arith.constant dense<0.000000e+00> : vector<8x128xf32>
    %48 = tpu.matmul %45, %47, %cst_27 {dimension_numbers = #tpu.dot_dimension_numbers<[1], [0], [0], [1], [0, 0, 1, 1], [], []>} : vector<8x128xbf16>, vector<128x128xbf16>, vector<8x128xf32> -> vector<8x128xf32>
    %49 = arith.addf %33, %48 : vector<8x128xf32>
    %50 = arith.truncf %44 : vector<8x128xf32> to vector<8x128xbf16>
    %c0_28 = arith.constant 0 : index
    %c2 = arith.constant 2 : index
    %c0_29 = arith.constant 0 : index
    %c0_30 = arith.constant 0 : index
    %51 = vector.load %arg5[%c0_28, %c2, %c0_29, %c0_30] : memref<4x3x128x128xbf16, #tpu.memory_space<vmem>>, vector<1x1x128x128xbf16>
    %52 = vector.shape_cast %51 : vector<1x1x128x128xbf16> to vector<128x128xbf16>
    %cst_31 = arith.constant dense<0.000000e+00> : vector<8x128xf32>
    %53 = tpu.matmul %50, %52, %cst_31 {dimension_numbers = #tpu.dot_dimension_numbers<[1], [0], [0], [1], [0, 0, 1, 1], [], []>} : vector<8x128xbf16>, vector<128x128xbf16>, vector<8x128xf32> -> vector<8x128xf32>
    %54 = arith.addf %49, %53 : vector<8x128xf32>
    %c0_32 = arith.constant 0 : index
    %c0_33 = arith.constant 0 : index
    %c0_34 = arith.constant 0 : index
    %55 = vector.load %arg6[%c0_32, %c0_33, %c0_34] : memref<4x1x128xf32, #tpu.memory_space<vmem>>, vector<1x1x128xf32>
    %56 = vector.shape_cast %55 : vector<1x1x128xf32> to vector<1x128xf32>
    %57 = vector.broadcast %56 : vector<1x128xf32> to vector<8x128xf32>
    %58 = arith.addf %54, %57 : vector<8x128xf32>
    %cst_35 = arith.constant 5.000000e-01 : f32
    %59 = vector.broadcast %cst_35 : f32 to vector<8x128xf32>
    %60 = arith.mulf %59, %58 : vector<8x128xf32>
    %cst_36 = arith.constant 4.471500e-02 : f32
    %61 = vector.broadcast %cst_36 : f32 to vector<8x128xf32>
    %62 = arith.mulf %61, %58 : vector<8x128xf32>
    %63 = arith.mulf %62, %58 : vector<8x128xf32>
    %64 = arith.mulf %63, %58 : vector<8x128xf32>
    %65 = arith.addf %58, %64 : vector<8x128xf32>
    %cst_37 = arith.constant 0.797884583 : f32
    %66 = vector.broadcast %cst_37 : f32 to vector<8x128xf32>
    %67 = arith.mulf %66, %65 : vector<8x128xf32>
    %68 = math.tanh %67 : vector<8x128xf32>
    %cst_38 = arith.constant 1.000000e+00 : f32
    %69 = vector.broadcast %cst_38 : f32 to vector<8x128xf32>
    %70 = arith.addf %69, %68 : vector<8x128xf32>
    %71 = arith.mulf %60, %70 : vector<8x128xf32>
    %72 = arith.truncf %71 : vector<8x128xf32> to vector<8x128xbf16>
    %c0_39 = arith.constant 0 : index
    %c1_40 = arith.constant 1 : index
    %c0_41 = arith.constant 0 : index
    %c0_42 = arith.constant 0 : index
    %73 = vector.load %arg7[%c0_39, %c1_40, %c0_41, %c0_42] : memref<4x3x128x128xbf16, #tpu.memory_space<vmem>>, vector<1x1x128x128xbf16>
    %74 = vector.shape_cast %73 : vector<1x1x128x128xbf16> to vector<128x128xbf16>
    %cst_43 = arith.constant dense<0.000000e+00> : vector<8x128xf32>
    %75 = tpu.matmul %72, %74, %cst_43 {dimension_numbers = #tpu.dot_dimension_numbers<[1], [0], [0], [1], [0, 0, 1, 1], [], []>} : vector<8x128xbf16>, vector<128x128xbf16>, vector<8x128xf32> -> vector<8x128xf32>
    %76 = tpu.iota {dimensions = array<i32: 0>} : vector<8x128xi32>
    %c1_i32_44 = arith.constant 1 : i32
    %77 = vector.broadcast %c1_i32_44 : i32 to vector<8x128xi32>
    %78 = arith.cmpi sge, %76, %77 : vector<8x128xi32>
    %c1_i32_45 = arith.constant 1 : i32
    %79 = tpu.dynamic_rotate %71 by %c1_i32_45 dim 0 : vector<8x128xf32>, i32 -> vector<8x128xf32>
    %cst_46 = arith.constant 0.000000e+00 : f32
    %80 = vector.broadcast %cst_46 : f32 to vector<8x128xf32>
    %81 = arith.select %78, %79, %80 : vector<8x128xi1>, vector<8x128xf32>
    %c7_i32_47 = arith.constant 7 : i32
    %82 = vector.broadcast %c7_i32_47 : i32 to vector<8x128xi32>
    %83 = arith.cmpi slt, %76, %82 : vector<8x128xi32>
    %c7_i32_48 = arith.constant 7 : i32
    %84 = tpu.dynamic_rotate %71 by %c7_i32_48 dim 0 : vector<8x128xf32>, i32 -> vector<8x128xf32>
    %cst_49 = arith.constant 0.000000e+00 : f32
    %85 = vector.broadcast %cst_49 : f32 to vector<8x128xf32>
    %86 = arith.select %83, %84, %85 : vector<8x128xi1>, vector<8x128xf32>
    %87 = arith.truncf %81 : vector<8x128xf32> to vector<8x128xbf16>
    %c0_50 = arith.constant 0 : index
    %c0_51 = arith.constant 0 : index
    %c0_52 = arith.constant 0 : index
    %c0_53 = arith.constant 0 : index
    %88 = vector.load %arg7[%c0_50, %c0_51, %c0_52, %c0_53] : memref<4x3x128x128xbf16, #tpu.memory_space<vmem>>, vector<1x1x128x128xbf16>
    %89 = vector.shape_cast %88 : vector<1x1x128x128xbf16> to vector<128x128xbf16>
    %cst_54 = arith.constant dense<0.000000e+00> : vector<8x128xf32>
    %90 = tpu.matmul %87, %89, %cst_54 {dimension_numbers = #tpu.dot_dimension_numbers<[1], [0], [0], [1], [0, 0, 1, 1], [], []>} : vector<8x128xbf16>, vector<128x128xbf16>, vector<8x128xf32> -> vector<8x128xf32>
    %91 = arith.addf %75, %90 : vector<8x128xf32>
    %92 = arith.truncf %86 : vector<8x128xf32> to vector<8x128xbf16>
    %c0_55 = arith.constant 0 : index
    %c2_56 = arith.constant 2 : index
    %c0_57 = arith.constant 0 : index
    %c0_58 = arith.constant 0 : index
    %93 = vector.load %arg7[%c0_55, %c2_56, %c0_57, %c0_58] : memref<4x3x128x128xbf16, #tpu.memory_space<vmem>>, vector<1x1x128x128xbf16>
    %94 = vector.shape_cast %93 : vector<1x1x128x128xbf16> to vector<128x128xbf16>
    %cst_59 = arith.constant dense<0.000000e+00> : vector<8x128xf32>
    %95 = tpu.matmul %92, %94, %cst_59 {dimension_numbers = #tpu.dot_dimension_numbers<[1], [0], [0], [1], [0, 0, 1, 1], [], []>} : vector<8x128xbf16>, vector<128x128xbf16>, vector<8x128xf32> -> vector<8x128xf32>
    %96 = arith.addf %91, %95 : vector<8x128xf32>
    %c0_60 = arith.constant 0 : index
    %c0_61 = arith.constant 0 : index
    %c0_62 = arith.constant 0 : index
    %97 = vector.load %arg8[%c0_60, %c0_61, %c0_62] : memref<4x1x128xf32, #tpu.memory_space<vmem>>, vector<1x1x128xf32>
    %98 = vector.shape_cast %97 : vector<1x1x128xf32> to vector<1x128xf32>
    %99 = vector.broadcast %98 : vector<1x128xf32> to vector<8x128xf32>
    %100 = arith.addf %96, %99 : vector<8x128xf32>
    %101 = arith.addf %100, %16 : vector<8x128xf32>
    %cst_63 = arith.constant 5.000000e-01 : f32
    %102 = vector.broadcast %cst_63 : f32 to vector<8x128xf32>
    %103 = arith.mulf %102, %101 : vector<8x128xf32>
    %cst_64 = arith.constant 4.471500e-02 : f32
    %104 = vector.broadcast %cst_64 : f32 to vector<8x128xf32>
    %105 = arith.mulf %104, %101 : vector<8x128xf32>
    %106 = arith.mulf %105, %101 : vector<8x128xf32>
    %107 = arith.mulf %106, %101 : vector<8x128xf32>
    %108 = arith.addf %101, %107 : vector<8x128xf32>
    %cst_65 = arith.constant 0.797884583 : f32
    %109 = vector.broadcast %cst_65 : f32 to vector<8x128xf32>
    %110 = arith.mulf %109, %108 : vector<8x128xf32>
    %111 = math.tanh %110 : vector<8x128xf32>
    %cst_66 = arith.constant 1.000000e+00 : f32
    %112 = vector.broadcast %cst_66 : f32 to vector<8x128xf32>
    %113 = arith.addf %112, %111 : vector<8x128xf32>
    %114 = arith.mulf %103, %113 : vector<8x128xf32>
    %115 = arith.truncf %114 : vector<8x128xf32> to vector<8x128xbf16>
    %c1_67 = arith.constant 1 : index
    %c1_68 = arith.constant 1 : index
    %c0_69 = arith.constant 0 : index
    %c0_70 = arith.constant 0 : index
    %116 = vector.load %arg5[%c1_67, %c1_68, %c0_69, %c0_70] : memref<4x3x128x128xbf16, #tpu.memory_space<vmem>>, vector<1x1x128x128xbf16>
    %117 = vector.shape_cast %116 : vector<1x1x128x128xbf16> to vector<128x128xbf16>
    %cst_71 = arith.constant dense<0.000000e+00> : vector<8x128xf32>
    %118 = tpu.matmul %115, %117, %cst_71 {dimension_numbers = #tpu.dot_dimension_numbers<[1], [0], [0], [1], [0, 0, 1, 1], [], []>} : vector<8x128xbf16>, vector<128x128xbf16>, vector<8x128xf32> -> vector<8x128xf32>
    %119 = tpu.iota {dimensions = array<i32: 0>} : vector<8x128xi32>
    %c2_i32 = arith.constant 2 : i32
    %120 = vector.broadcast %c2_i32 : i32 to vector<8x128xi32>
    %121 = arith.cmpi sge, %119, %120 : vector<8x128xi32>
    %c2_i32_72 = arith.constant 2 : i32
    %122 = tpu.dynamic_rotate %114 by %c2_i32_72 dim 0 : vector<8x128xf32>, i32 -> vector<8x128xf32>
    %cst_73 = arith.constant 0.000000e+00 : f32
    %123 = vector.broadcast %cst_73 : f32 to vector<8x128xf32>
    %124 = arith.select %121, %122, %123 : vector<8x128xi1>, vector<8x128xf32>
    %c6_i32 = arith.constant 6 : i32
    %125 = vector.broadcast %c6_i32 : i32 to vector<8x128xi32>
    %126 = arith.cmpi slt, %119, %125 : vector<8x128xi32>
    %c6_i32_74 = arith.constant 6 : i32
    %127 = tpu.dynamic_rotate %114 by %c6_i32_74 dim 0 : vector<8x128xf32>, i32 -> vector<8x128xf32>
    %cst_75 = arith.constant 0.000000e+00 : f32
    %128 = vector.broadcast %cst_75 : f32 to vector<8x128xf32>
    %129 = arith.select %126, %127, %128 : vector<8x128xi1>, vector<8x128xf32>
    %130 = arith.truncf %124 : vector<8x128xf32> to vector<8x128xbf16>
    %c1_76 = arith.constant 1 : index
    %c0_77 = arith.constant 0 : index
    %c0_78 = arith.constant 0 : index
    %c0_79 = arith.constant 0 : index
    %131 = vector.load %arg5[%c1_76, %c0_77, %c0_78, %c0_79] : memref<4x3x128x128xbf16, #tpu.memory_space<vmem>>, vector<1x1x128x128xbf16>
    %132 = vector.shape_cast %131 : vector<1x1x128x128xbf16> to vector<128x128xbf16>
    %cst_80 = arith.constant dense<0.000000e+00> : vector<8x128xf32>
    %133 = tpu.matmul %130, %132, %cst_80 {dimension_numbers = #tpu.dot_dimension_numbers<[1], [0], [0], [1], [0, 0, 1, 1], [], []>} : vector<8x128xbf16>, vector<128x128xbf16>, vector<8x128xf32> -> vector<8x128xf32>
    %134 = arith.addf %118, %133 : vector<8x128xf32>
    %135 = arith.truncf %129 : vector<8x128xf32> to vector<8x128xbf16>
    %c1_81 = arith.constant 1 : index
    %c2_82 = arith.constant 2 : index
    %c0_83 = arith.constant 0 : index
    %c0_84 = arith.constant 0 : index
    %136 = vector.load %arg5[%c1_81, %c2_82, %c0_83, %c0_84] : memref<4x3x128x128xbf16, #tpu.memory_space<vmem>>, vector<1x1x128x128xbf16>
    %137 = vector.shape_cast %136 : vector<1x1x128x128xbf16> to vector<128x128xbf16>
    %cst_85 = arith.constant dense<0.000000e+00> : vector<8x128xf32>
    %138 = tpu.matmul %135, %137, %cst_85 {dimension_numbers = #tpu.dot_dimension_numbers<[1], [0], [0], [1], [0, 0, 1, 1], [], []>} : vector<8x128xbf16>, vector<128x128xbf16>, vector<8x128xf32> -> vector<8x128xf32>
    %139 = arith.addf %134, %138 : vector<8x128xf32>
    %c1_86 = arith.constant 1 : index
    %c0_87 = arith.constant 0 : index
    %c0_88 = arith.constant 0 : index
    %140 = vector.load %arg6[%c1_86, %c0_87, %c0_88] : memref<4x1x128xf32, #tpu.memory_space<vmem>>, vector<1x1x128xf32>
    %141 = vector.shape_cast %140 : vector<1x1x128xf32> to vector<1x128xf32>
    %142 = vector.broadcast %141 : vector<1x128xf32> to vector<8x128xf32>
    %143 = arith.addf %139, %142 : vector<8x128xf32>
    %cst_89 = arith.constant 5.000000e-01 : f32
    %144 = vector.broadcast %cst_89 : f32 to vector<8x128xf32>
    %145 = arith.mulf %144, %143 : vector<8x128xf32>
    %cst_90 = arith.constant 4.471500e-02 : f32
    %146 = vector.broadcast %cst_90 : f32 to vector<8x128xf32>
    %147 = arith.mulf %146, %143 : vector<8x128xf32>
    %148 = arith.mulf %147, %143 : vector<8x128xf32>
    %149 = arith.mulf %148, %143 : vector<8x128xf32>
    %150 = arith.addf %143, %149 : vector<8x128xf32>
    %cst_91 = arith.constant 0.797884583 : f32
    %151 = vector.broadcast %cst_91 : f32 to vector<8x128xf32>
    %152 = arith.mulf %151, %150 : vector<8x128xf32>
    %153 = math.tanh %152 : vector<8x128xf32>
    %cst_92 = arith.constant 1.000000e+00 : f32
    %154 = vector.broadcast %cst_92 : f32 to vector<8x128xf32>
    %155 = arith.addf %154, %153 : vector<8x128xf32>
    %156 = arith.mulf %145, %155 : vector<8x128xf32>
    %157 = arith.truncf %156 : vector<8x128xf32> to vector<8x128xbf16>
    %c1_93 = arith.constant 1 : index
    %c1_94 = arith.constant 1 : index
    %c0_95 = arith.constant 0 : index
    %c0_96 = arith.constant 0 : index
    %158 = vector.load %arg7[%c1_93, %c1_94, %c0_95, %c0_96] : memref<4x3x128x128xbf16, #tpu.memory_space<vmem>>, vector<1x1x128x128xbf16>
    %159 = vector.shape_cast %158 : vector<1x1x128x128xbf16> to vector<128x128xbf16>
    %cst_97 = arith.constant dense<0.000000e+00> : vector<8x128xf32>
    %160 = tpu.matmul %157, %159, %cst_97 {dimension_numbers = #tpu.dot_dimension_numbers<[1], [0], [0], [1], [0, 0, 1, 1], [], []>} : vector<8x128xbf16>, vector<128x128xbf16>, vector<8x128xf32> -> vector<8x128xf32>
    %161 = tpu.iota {dimensions = array<i32: 0>} : vector<8x128xi32>
    %c2_i32_98 = arith.constant 2 : i32
    %162 = vector.broadcast %c2_i32_98 : i32 to vector<8x128xi32>
    %163 = arith.cmpi sge, %161, %162 : vector<8x128xi32>
    %c2_i32_99 = arith.constant 2 : i32
    %164 = tpu.dynamic_rotate %156 by %c2_i32_99 dim 0 : vector<8x128xf32>, i32 -> vector<8x128xf32>
    %cst_100 = arith.constant 0.000000e+00 : f32
    %165 = vector.broadcast %cst_100 : f32 to vector<8x128xf32>
    %166 = arith.select %163, %164, %165 : vector<8x128xi1>, vector<8x128xf32>
    %c6_i32_101 = arith.constant 6 : i32
    %167 = vector.broadcast %c6_i32_101 : i32 to vector<8x128xi32>
    %168 = arith.cmpi slt, %161, %167 : vector<8x128xi32>
    %c6_i32_102 = arith.constant 6 : i32
    %169 = tpu.dynamic_rotate %156 by %c6_i32_102 dim 0 : vector<8x128xf32>, i32 -> vector<8x128xf32>
    %cst_103 = arith.constant 0.000000e+00 : f32
    %170 = vector.broadcast %cst_103 : f32 to vector<8x128xf32>
    %171 = arith.select %168, %169, %170 : vector<8x128xi1>, vector<8x128xf32>
    %172 = arith.truncf %166 : vector<8x128xf32> to vector<8x128xbf16>
    %c1_104 = arith.constant 1 : index
    %c0_105 = arith.constant 0 : index
    %c0_106 = arith.constant 0 : index
    %c0_107 = arith.constant 0 : index
    %173 = vector.load %arg7[%c1_104, %c0_105, %c0_106, %c0_107] : memref<4x3x128x128xbf16, #tpu.memory_space<vmem>>, vector<1x1x128x128xbf16>
    %174 = vector.shape_cast %173 : vector<1x1x128x128xbf16> to vector<128x128xbf16>
    %cst_108 = arith.constant dense<0.000000e+00> : vector<8x128xf32>
    %175 = tpu.matmul %172, %174, %cst_108 {dimension_numbers = #tpu.dot_dimension_numbers<[1], [0], [0], [1], [0, 0, 1, 1], [], []>} : vector<8x128xbf16>, vector<128x128xbf16>, vector<8x128xf32> -> vector<8x128xf32>
    %176 = arith.addf %160, %175 : vector<8x128xf32>
    %177 = arith.truncf %171 : vector<8x128xf32> to vector<8x128xbf16>
    %c1_109 = arith.constant 1 : index
    %c2_110 = arith.constant 2 : index
    %c0_111 = arith.constant 0 : index
    %c0_112 = arith.constant 0 : index
    %178 = vector.load %arg7[%c1_109, %c2_110, %c0_111, %c0_112] : memref<4x3x128x128xbf16, #tpu.memory_space<vmem>>, vector<1x1x128x128xbf16>
    %179 = vector.shape_cast %178 : vector<1x1x128x128xbf16> to vector<128x128xbf16>
    %cst_113 = arith.constant dense<0.000000e+00> : vector<8x128xf32>
    %180 = tpu.matmul %177, %179, %cst_113 {dimension_numbers = #tpu.dot_dimension_numbers<[1], [0], [0], [1], [0, 0, 1, 1], [], []>} : vector<8x128xbf16>, vector<128x128xbf16>, vector<8x128xf32> -> vector<8x128xf32>
    %181 = arith.addf %176, %180 : vector<8x128xf32>
    %c1_114 = arith.constant 1 : index
    %c0_115 = arith.constant 0 : index
    %c0_116 = arith.constant 0 : index
    %182 = vector.load %arg8[%c1_114, %c0_115, %c0_116] : memref<4x1x128xf32, #tpu.memory_space<vmem>>, vector<1x1x128xf32>
    %183 = vector.shape_cast %182 : vector<1x1x128xf32> to vector<1x128xf32>
    %184 = vector.broadcast %183 : vector<1x128xf32> to vector<8x128xf32>
    %185 = arith.addf %181, %184 : vector<8x128xf32>
    %186 = arith.addf %185, %101 : vector<8x128xf32>
    %cst_117 = arith.constant 5.000000e-01 : f32
    %187 = vector.broadcast %cst_117 : f32 to vector<8x128xf32>
    %188 = arith.mulf %187, %186 : vector<8x128xf32>
    %cst_118 = arith.constant 4.471500e-02 : f32
    %189 = vector.broadcast %cst_118 : f32 to vector<8x128xf32>
    %190 = arith.mulf %189, %186 : vector<8x128xf32>
    %191 = arith.mulf %190, %186 : vector<8x128xf32>
    %192 = arith.mulf %191, %186 : vector<8x128xf32>
    %193 = arith.addf %186, %192 : vector<8x128xf32>
    %cst_119 = arith.constant 0.797884583 : f32
    %194 = vector.broadcast %cst_119 : f32 to vector<8x128xf32>
    %195 = arith.mulf %194, %193 : vector<8x128xf32>
    %196 = math.tanh %195 : vector<8x128xf32>
    %cst_120 = arith.constant 1.000000e+00 : f32
    %197 = vector.broadcast %cst_120 : f32 to vector<8x128xf32>
    %198 = arith.addf %197, %196 : vector<8x128xf32>
    %199 = arith.mulf %188, %198 : vector<8x128xf32>
    %200 = arith.truncf %199 : vector<8x128xf32> to vector<8x128xbf16>
    %c2_121 = arith.constant 2 : index
    %c1_122 = arith.constant 1 : index
    %c0_123 = arith.constant 0 : index
    %c0_124 = arith.constant 0 : index
    %201 = vector.load %arg5[%c2_121, %c1_122, %c0_123, %c0_124] : memref<4x3x128x128xbf16, #tpu.memory_space<vmem>>, vector<1x1x128x128xbf16>
    %202 = vector.shape_cast %201 : vector<1x1x128x128xbf16> to vector<128x128xbf16>
    %cst_125 = arith.constant dense<0.000000e+00> : vector<8x128xf32>
    %203 = tpu.matmul %200, %202, %cst_125 {dimension_numbers = #tpu.dot_dimension_numbers<[1], [0], [0], [1], [0, 0, 1, 1], [], []>} : vector<8x128xbf16>, vector<128x128xbf16>, vector<8x128xf32> -> vector<8x128xf32>
    %204 = tpu.iota {dimensions = array<i32: 0>} : vector<8x128xi32>
    %c4_i32 = arith.constant 4 : i32
    %205 = vector.broadcast %c4_i32 : i32 to vector<8x128xi32>
    %206 = arith.cmpi sge, %204, %205 : vector<8x128xi32>
    %c4_i32_126 = arith.constant 4 : i32
    %207 = tpu.dynamic_rotate %199 by %c4_i32_126 dim 0 : vector<8x128xf32>, i32 -> vector<8x128xf32>
    %cst_127 = arith.constant 0.000000e+00 : f32
    %208 = vector.broadcast %cst_127 : f32 to vector<8x128xf32>
    %209 = arith.select %206, %207, %208 : vector<8x128xi1>, vector<8x128xf32>
    %c4_i32_128 = arith.constant 4 : i32
    %210 = vector.broadcast %c4_i32_128 : i32 to vector<8x128xi32>
    %211 = arith.cmpi slt, %204, %210 : vector<8x128xi32>
    %c4_i32_129 = arith.constant 4 : i32
    %212 = tpu.dynamic_rotate %199 by %c4_i32_129 dim 0 : vector<8x128xf32>, i32 -> vector<8x128xf32>
    %cst_130 = arith.constant 0.000000e+00 : f32
    %213 = vector.broadcast %cst_130 : f32 to vector<8x128xf32>
    %214 = arith.select %211, %212, %213 : vector<8x128xi1>, vector<8x128xf32>
    %215 = arith.truncf %209 : vector<8x128xf32> to vector<8x128xbf16>
    %c2_131 = arith.constant 2 : index
    %c0_132 = arith.constant 0 : index
    %c0_133 = arith.constant 0 : index
    %c0_134 = arith.constant 0 : index
    %216 = vector.load %arg5[%c2_131, %c0_132, %c0_133, %c0_134] : memref<4x3x128x128xbf16, #tpu.memory_space<vmem>>, vector<1x1x128x128xbf16>
    %217 = vector.shape_cast %216 : vector<1x1x128x128xbf16> to vector<128x128xbf16>
    %cst_135 = arith.constant dense<0.000000e+00> : vector<8x128xf32>
    %218 = tpu.matmul %215, %217, %cst_135 {dimension_numbers = #tpu.dot_dimension_numbers<[1], [0], [0], [1], [0, 0, 1, 1], [], []>} : vector<8x128xbf16>, vector<128x128xbf16>, vector<8x128xf32> -> vector<8x128xf32>
    %219 = arith.addf %203, %218 : vector<8x128xf32>
    %220 = arith.truncf %214 : vector<8x128xf32> to vector<8x128xbf16>
    %c2_136 = arith.constant 2 : index
    %c2_137 = arith.constant 2 : index
    %c0_138 = arith.constant 0 : index
    %c0_139 = arith.constant 0 : index
    %221 = vector.load %arg5[%c2_136, %c2_137, %c0_138, %c0_139] : memref<4x3x128x128xbf16, #tpu.memory_space<vmem>>, vector<1x1x128x128xbf16>
    %222 = vector.shape_cast %221 : vector<1x1x128x128xbf16> to vector<128x128xbf16>
    %cst_140 = arith.constant dense<0.000000e+00> : vector<8x128xf32>
    %223 = tpu.matmul %220, %222, %cst_140 {dimension_numbers = #tpu.dot_dimension_numbers<[1], [0], [0], [1], [0, 0, 1, 1], [], []>} : vector<8x128xbf16>, vector<128x128xbf16>, vector<8x128xf32> -> vector<8x128xf32>
    %224 = arith.addf %219, %223 : vector<8x128xf32>
    %c2_141 = arith.constant 2 : index
    %c0_142 = arith.constant 0 : index
    %c0_143 = arith.constant 0 : index
    %225 = vector.load %arg6[%c2_141, %c0_142, %c0_143] : memref<4x1x128xf32, #tpu.memory_space<vmem>>, vector<1x1x128xf32>
    %226 = vector.shape_cast %225 : vector<1x1x128xf32> to vector<1x128xf32>
    %227 = vector.broadcast %226 : vector<1x128xf32> to vector<8x128xf32>
    %228 = arith.addf %224, %227 : vector<8x128xf32>
    %cst_144 = arith.constant 5.000000e-01 : f32
    %229 = vector.broadcast %cst_144 : f32 to vector<8x128xf32>
    %230 = arith.mulf %229, %228 : vector<8x128xf32>
    %cst_145 = arith.constant 4.471500e-02 : f32
    %231 = vector.broadcast %cst_145 : f32 to vector<8x128xf32>
    %232 = arith.mulf %231, %228 : vector<8x128xf32>
    %233 = arith.mulf %232, %228 : vector<8x128xf32>
    %234 = arith.mulf %233, %228 : vector<8x128xf32>
    %235 = arith.addf %228, %234 : vector<8x128xf32>
    %cst_146 = arith.constant 0.797884583 : f32
    %236 = vector.broadcast %cst_146 : f32 to vector<8x128xf32>
    %237 = arith.mulf %236, %235 : vector<8x128xf32>
    %238 = math.tanh %237 : vector<8x128xf32>
    %cst_147 = arith.constant 1.000000e+00 : f32
    %239 = vector.broadcast %cst_147 : f32 to vector<8x128xf32>
    %240 = arith.addf %239, %238 : vector<8x128xf32>
    %241 = arith.mulf %230, %240 : vector<8x128xf32>
    %242 = arith.truncf %241 : vector<8x128xf32> to vector<8x128xbf16>
    %c2_148 = arith.constant 2 : index
    %c1_149 = arith.constant 1 : index
    %c0_150 = arith.constant 0 : index
    %c0_151 = arith.constant 0 : index
    %243 = vector.load %arg7[%c2_148, %c1_149, %c0_150, %c0_151] : memref<4x3x128x128xbf16, #tpu.memory_space<vmem>>, vector<1x1x128x128xbf16>
    %244 = vector.shape_cast %243 : vector<1x1x128x128xbf16> to vector<128x128xbf16>
    %cst_152 = arith.constant dense<0.000000e+00> : vector<8x128xf32>
    %245 = tpu.matmul %242, %244, %cst_152 {dimension_numbers = #tpu.dot_dimension_numbers<[1], [0], [0], [1], [0, 0, 1, 1], [], []>} : vector<8x128xbf16>, vector<128x128xbf16>, vector<8x128xf32> -> vector<8x128xf32>
    %246 = tpu.iota {dimensions = array<i32: 0>} : vector<8x128xi32>
    %c4_i32_153 = arith.constant 4 : i32
    %247 = vector.broadcast %c4_i32_153 : i32 to vector<8x128xi32>
    %248 = arith.cmpi sge, %246, %247 : vector<8x128xi32>
    %c4_i32_154 = arith.constant 4 : i32
    %249 = tpu.dynamic_rotate %241 by %c4_i32_154 dim 0 : vector<8x128xf32>, i32 -> vector<8x128xf32>
    %cst_155 = arith.constant 0.000000e+00 : f32
    %250 = vector.broadcast %cst_155 : f32 to vector<8x128xf32>
    %251 = arith.select %248, %249, %250 : vector<8x128xi1>, vector<8x128xf32>
    %c4_i32_156 = arith.constant 4 : i32
    %252 = vector.broadcast %c4_i32_156 : i32 to vector<8x128xi32>
    %253 = arith.cmpi slt, %246, %252 : vector<8x128xi32>
    %c4_i32_157 = arith.constant 4 : i32
    %254 = tpu.dynamic_rotate %241 by %c4_i32_157 dim 0 : vector<8x128xf32>, i32 -> vector<8x128xf32>
    %cst_158 = arith.constant 0.000000e+00 : f32
    %255 = vector.broadcast %cst_158 : f32 to vector<8x128xf32>
    %256 = arith.select %253, %254, %255 : vector<8x128xi1>, vector<8x128xf32>
    %257 = arith.truncf %251 : vector<8x128xf32> to vector<8x128xbf16>
    %c2_159 = arith.constant 2 : index
    %c0_160 = arith.constant 0 : index
    %c0_161 = arith.constant 0 : index
    %c0_162 = arith.constant 0 : index
    %258 = vector.load %arg7[%c2_159, %c0_160, %c0_161, %c0_162] : memref<4x3x128x128xbf16, #tpu.memory_space<vmem>>, vector<1x1x128x128xbf16>
    %259 = vector.shape_cast %258 : vector<1x1x128x128xbf16> to vector<128x128xbf16>
    %cst_163 = arith.constant dense<0.000000e+00> : vector<8x128xf32>
    %260 = tpu.matmul %257, %259, %cst_163 {dimension_numbers = #tpu.dot_dimension_numbers<[1], [0], [0], [1], [0, 0, 1, 1], [], []>} : vector<8x128xbf16>, vector<128x128xbf16>, vector<8x128xf32> -> vector<8x128xf32>
    %261 = arith.addf %245, %260 : vector<8x128xf32>
    %262 = arith.truncf %256 : vector<8x128xf32> to vector<8x128xbf16>
    %c2_164 = arith.constant 2 : index
    %c2_165 = arith.constant 2 : index
    %c0_166 = arith.constant 0 : index
    %c0_167 = arith.constant 0 : index
    %263 = vector.load %arg7[%c2_164, %c2_165, %c0_166, %c0_167] : memref<4x3x128x128xbf16, #tpu.memory_space<vmem>>, vector<1x1x128x128xbf16>
    %264 = vector.shape_cast %263 : vector<1x1x128x128xbf16> to vector<128x128xbf16>
    %cst_168 = arith.constant dense<0.000000e+00> : vector<8x128xf32>
    %265 = tpu.matmul %262, %264, %cst_168 {dimension_numbers = #tpu.dot_dimension_numbers<[1], [0], [0], [1], [0, 0, 1, 1], [], []>} : vector<8x128xbf16>, vector<128x128xbf16>, vector<8x128xf32> -> vector<8x128xf32>
    %266 = arith.addf %261, %265 : vector<8x128xf32>
    %c2_169 = arith.constant 2 : index
    %c0_170 = arith.constant 0 : index
    %c0_171 = arith.constant 0 : index
    %267 = vector.load %arg8[%c2_169, %c0_170, %c0_171] : memref<4x1x128xf32, #tpu.memory_space<vmem>>, vector<1x1x128xf32>
    %268 = vector.shape_cast %267 : vector<1x1x128xf32> to vector<1x128xf32>
    %269 = vector.broadcast %268 : vector<1x128xf32> to vector<8x128xf32>
    %270 = arith.addf %266, %269 : vector<8x128xf32>
    %271 = arith.addf %270, %186 : vector<8x128xf32>
    %272 = arith.truncf %271 : vector<8x128xf32> to vector<8x128xbf16>
    %c3 = arith.constant 3 : index
    %c0_172 = arith.constant 0 : index
    %c0_173 = arith.constant 0 : index
    %273 = vector.load %arg9[%c3, %c0_172, %c0_173] : memref<4x128x128xbf16, #tpu.memory_space<vmem>>, vector<1x128x128xbf16>
    %274 = vector.shape_cast %273 : vector<1x128x128xbf16> to vector<128x128xbf16>
    %cst_174 = arith.constant dense<0.000000e+00> : vector<8x128xf32>
    %275 = tpu.matmul %272, %274, %cst_174 {dimension_numbers = #tpu.dot_dimension_numbers<[1], [0], [0], [1], [0, 0, 1, 1], [], []>} : vector<8x128xbf16>, vector<128x128xbf16>, vector<8x128xf32> -> vector<8x128xf32>
    %c3_175 = arith.constant 3 : index
    %c0_176 = arith.constant 0 : index
    %c0_177 = arith.constant 0 : index
    %276 = vector.load %arg10[%c3_175, %c0_176, %c0_177] : memref<4x1x128xf32, #tpu.memory_space<vmem>>, vector<1x1x128xf32>
    %277 = vector.shape_cast %276 : vector<1x1x128xf32> to vector<1x128xf32>
    %278 = vector.broadcast %277 : vector<1x128xf32> to vector<8x128xf32>
    %279 = arith.addf %275, %278 : vector<8x128xf32>
    %cst_178 = arith.constant 5.000000e-01 : f32
    %280 = vector.broadcast %cst_178 : f32 to vector<8x128xf32>
    %281 = arith.mulf %280, %271 : vector<8x128xf32>
    %cst_179 = arith.constant 4.471500e-02 : f32
    %282 = vector.broadcast %cst_179 : f32 to vector<8x128xf32>
    %283 = arith.mulf %282, %271 : vector<8x128xf32>
    %284 = arith.mulf %283, %271 : vector<8x128xf32>
    %285 = arith.mulf %284, %271 : vector<8x128xf32>
    %286 = arith.addf %271, %285 : vector<8x128xf32>
    %cst_180 = arith.constant 0.797884583 : f32
    %287 = vector.broadcast %cst_180 : f32 to vector<8x128xf32>
    %288 = arith.mulf %287, %286 : vector<8x128xf32>
    %289 = math.tanh %288 : vector<8x128xf32>
    %cst_181 = arith.constant 1.000000e+00 : f32
    %290 = vector.broadcast %cst_181 : f32 to vector<8x128xf32>
    %291 = arith.addf %290, %289 : vector<8x128xf32>
    %292 = arith.mulf %281, %291 : vector<8x128xf32>
    %293 = arith.truncf %292 : vector<8x128xf32> to vector<8x128xbf16>
    %c3_182 = arith.constant 3 : index
    %c1_183 = arith.constant 1 : index
    %c0_184 = arith.constant 0 : index
    %c0_185 = arith.constant 0 : index
    %294 = vector.load %arg5[%c3_182, %c1_183, %c0_184, %c0_185] : memref<4x3x128x128xbf16, #tpu.memory_space<vmem>>, vector<1x1x128x128xbf16>
    %295 = vector.shape_cast %294 : vector<1x1x128x128xbf16> to vector<128x128xbf16>
    %cst_186 = arith.constant dense<0.000000e+00> : vector<8x128xf32>
    %296 = tpu.matmul %293, %295, %cst_186 {dimension_numbers = #tpu.dot_dimension_numbers<[1], [0], [0], [1], [0, 0, 1, 1], [], []>} : vector<8x128xbf16>, vector<128x128xbf16>, vector<8x128xf32> -> vector<8x128xf32>
    %c3_187 = arith.constant 3 : index
    %c0_188 = arith.constant 0 : index
    %c0_189 = arith.constant 0 : index
    %297 = vector.load %arg6[%c3_187, %c0_188, %c0_189] : memref<4x1x128xf32, #tpu.memory_space<vmem>>, vector<1x1x128xf32>
    %298 = vector.shape_cast %297 : vector<1x1x128xf32> to vector<1x128xf32>
    %299 = vector.broadcast %298 : vector<1x128xf32> to vector<8x128xf32>
    %300 = arith.addf %296, %299 : vector<8x128xf32>
    %cst_190 = arith.constant 5.000000e-01 : f32
    %301 = vector.broadcast %cst_190 : f32 to vector<8x128xf32>
    %302 = arith.mulf %301, %300 : vector<8x128xf32>
    %cst_191 = arith.constant 4.471500e-02 : f32
    %303 = vector.broadcast %cst_191 : f32 to vector<8x128xf32>
    %304 = arith.mulf %303, %300 : vector<8x128xf32>
    %305 = arith.mulf %304, %300 : vector<8x128xf32>
    %306 = arith.mulf %305, %300 : vector<8x128xf32>
    %307 = arith.addf %300, %306 : vector<8x128xf32>
    %cst_192 = arith.constant 0.797884583 : f32
    %308 = vector.broadcast %cst_192 : f32 to vector<8x128xf32>
    %309 = arith.mulf %308, %307 : vector<8x128xf32>
    %310 = math.tanh %309 : vector<8x128xf32>
    %cst_193 = arith.constant 1.000000e+00 : f32
    %311 = vector.broadcast %cst_193 : f32 to vector<8x128xf32>
    %312 = arith.addf %311, %310 : vector<8x128xf32>
    %313 = arith.mulf %302, %312 : vector<8x128xf32>
    %314 = arith.truncf %313 : vector<8x128xf32> to vector<8x128xbf16>
    %c3_194 = arith.constant 3 : index
    %c1_195 = arith.constant 1 : index
    %c0_196 = arith.constant 0 : index
    %c0_197 = arith.constant 0 : index
    %315 = vector.load %arg7[%c3_194, %c1_195, %c0_196, %c0_197] : memref<4x3x128x128xbf16, #tpu.memory_space<vmem>>, vector<1x1x128x128xbf16>
    %316 = vector.shape_cast %315 : vector<1x1x128x128xbf16> to vector<128x128xbf16>
    %cst_198 = arith.constant dense<0.000000e+00> : vector<8x128xf32>
    %317 = tpu.matmul %314, %316, %cst_198 {dimension_numbers = #tpu.dot_dimension_numbers<[1], [0], [0], [1], [0, 0, 1, 1], [], []>} : vector<8x128xbf16>, vector<128x128xbf16>, vector<8x128xf32> -> vector<8x128xf32>
    %c3_199 = arith.constant 3 : index
    %c0_200 = arith.constant 0 : index
    %c0_201 = arith.constant 0 : index
    %318 = vector.load %arg8[%c3_199, %c0_200, %c0_201] : memref<4x1x128xf32, #tpu.memory_space<vmem>>, vector<1x1x128xf32>
    %319 = vector.shape_cast %318 : vector<1x1x128xf32> to vector<1x128xf32>
    %320 = vector.broadcast %319 : vector<1x128xf32> to vector<8x128xf32>
    %321 = arith.addf %317, %320 : vector<8x128xf32>
    %322 = arith.addf %321, %279 : vector<8x128xf32>
    %c0_202 = arith.constant 0 : index
    %c0_203 = arith.constant 0 : index
    %c0_204 = arith.constant 0 : index
    %323 = vector.load %arg11[%c0_202, %c0_203, %c0_204] : memref<1x8x128xf32, #tpu.memory_space<vmem>>, vector<1x8x128xf32>
    %324 = vector.shape_cast %323 : vector<1x8x128xf32> to vector<8x128xf32>
    %325 = vector.shape_cast %322 : vector<8x128xf32> to vector<1x8x128xf32>
    tpu.vector_store %arg11[%c0_202, %c0_203, %c0_204], %325 {strides = array<i32>} : memref<1x8x128xf32, #tpu.memory_space<vmem>>, vector<1x8x128xf32>,
    return
  }
  func.func @transform_0(%arg0: i32) -> (i32, i32, i32) {
    %c0_i32 = arith.constant 0 : i32
    %c0_i32_0 = arith.constant 0 : i32
    %c0_i32_1 = arith.constant 0 : i32
    return %arg0, %c0_i32, %c0_i32_0 : i32, i32, i32
  }
  func.func @transform_1(%arg0: i32) -> (i32, i32, i32) {
    %c0_i32 = arith.constant 0 : i32
    %c0_i32_0 = arith.constant 0 : i32
    %c0_i32_1 = arith.constant 0 : i32
    return %arg0, %c0_i32, %c0_i32_0 : i32, i32, i32
  }
  func.func @transform_2(%arg0: i32) -> (i32, i32) {
    %c0_i32 = arith.constant 0 : i32
    %c0_i32_0 = arith.constant 0 : i32
    %c0_i32_1 = arith.constant 0 : i32
    return %c0_i32, %c0_i32_0 : i32, i32
  }
  func.func @transform_3(%arg0: i32) -> (i32, i32) {
    %c0_i32 = arith.constant 0 : i32
    %c0_i32_0 = arith.constant 0 : i32
    %c0_i32_1 = arith.constant 0 : i32
    return %c0_i32, %c0_i32_0 : i32, i32
  }
  func.func @transform_4(%arg0: i32) -> (i32, i32, i32, i32) {
    %c0_i32 = arith.constant 0 : i32
    %c0_i32_0 = arith.constant 0 : i32
    %c0_i32_1 = arith.constant 0 : i32
    %c0_i32_2 = arith.constant 0 : i32
    %c0_i32_3 = arith.constant 0 : i32
    return %c0_i32, %c0_i32_0, %c0_i32_1, %c0_i32_2 : i32, i32, i32, i32
  }
  func.func @transform_5(%arg0: i32) -> (i32, i32, i32) {
    %c0_i32 = arith.constant 0 : i32
    %c0_i32_0 = arith.constant 0 : i32
    %c0_i32_1 = arith.constant 0 : i32
    %c0_i32_2 = arith.constant 0 : i32
    return %c0_i32, %c0_i32_0, %c0_i32_1 : i32, i32, i32
  }
  func.func @transform_6(%arg0: i32) -> (i32, i32, i32, i32) {
    %c0_i32 = arith.constant 0 : i32
    %c0_i32_0 = arith.constant 0 : i32
    %c0_i32_1 = arith.constant 0 : i32
    %c0_i32_2 = arith.constant 0 : i32
    %c0_i32_3 = arith.constant 0 : i32
    return %c0_i32, %c0_i32_0, %c0_i32_1, %c0_i32_2 : i32, i32, i32, i32
  }
  func.func @transform_7(%arg0: i32) -> (i32, i32, i32) {
    %c0_i32 = arith.constant 0 : i32
    %c0_i32_0 = arith.constant 0 : i32
    %c0_i32_1 = arith.constant 0 : i32
    %c0_i32_2 = arith.constant 0 : i32
    return %c0_i32, %c0_i32_0, %c0_i32_1 : i32, i32, i32
  }
  func.func @transform_8(%arg0: i32) -> (i32, i32, i32) {
    %c0_i32 = arith.constant 0 : i32
    %c0_i32_0 = arith.constant 0 : i32
    %c0_i32_1 = arith.constant 0 : i32
    %c0_i32_2 = arith.constant 0 : i32
    return %c0_i32, %c0_i32_0, %c0_i32_1 : i32, i32, i32
  }
  func.func @transform_9(%arg0: i32) -> (i32, i32, i32) {
    %c0_i32 = arith.constant 0 : i32
    %c0_i32_0 = arith.constant 0 : i32
    %c0_i32_1 = arith.constant 0 : i32
    %c0_i32_2 = arith.constant 0 : i32
    return %c0_i32, %c0_i32_0, %c0_i32_1 : i32, i32, i32
  }
  func.func @transform_10(%arg0: i32) -> (i32, i32, i32) {
    %c0_i32 = arith.constant 0 : i32
    %c0_i32_0 = arith.constant 0 : i32
    %c0_i32_1 = arith.constant 0 : i32
    return %arg0, %c0_i32, %c0_i32_0 : i32, i32, i32
  }
}

</mosaic_0001>

<bundles_post_ra>
// kernel: tpu_custom_call.1
= control target key start
LH: loop header
LB: loop body
LE: loop exit
PB: predicated region body
PF: predicated region fallthrough
CT: control target
= control target key end

     0   :  { %s3854_s0 = inlined_call_operand.vmem [shape: f32[2,8,6], index: 0, kind: input, shape index: {}]   ;;  %s3855_s1 = inlined_call_operand.vmem [shape: f32[2,8,6], index: 1, kind: input, shape index: {}]   ;;  %s3856_s2 = inlined_call_operand.vmem [shape: bf16[6,128], index: 2, kind: input, shape index: {}]   ;;  %s3857_s3 = inlined_call_operand.vmem [shape: f32[1,128], index: 3, kind: input, shape index: {}]   ;;  %s3858_s4 = inlined_call_operand.hbm [shape: bf16[4,3,128,128], index: 4, kind: input, shape index: {}]   ;;  %s3859_s5 = inlined_call_operand.vmem [shape: f32[4,1,128], index: 5, kind: input, shape index: {}]   ;;  %s3860_s6 = inlined_call_operand.hbm [shape: bf16[4,3,128,128], index: 6, kind: input, shape index: {}]   ;;  %s3861_s7 = inlined_call_operand.vmem [shape: f32[4,1,128], index: 7, kind: input, shape index: {}]   ;;  %s3862_s8 = inlined_call_operand.hbm [shape: bf16[4,128,128], index: 8, kind: input, shape index: {}]   ;;  %s3863_s9 = inlined_call_operand.vmem [shape: f32[4,1,128], index: 9, kind: input, shape index: {}]   ;;  %s3864_s10 = inlined_call_operand.hbm [shape: f32[2,8,128], index: 10, kind: output, shape index: {}]  }
   0x1   :  { %3866 = sst [smem:[#allocation14_spill]] %s3858_s4 }
   0x2   :  { %3867 = sst [smem:[#allocation15_spill]] %s3860_s6 }
   0x3   :  { %15 = vsyncpa [#allocation3], 0 }
   0x4   :  { %16 = vsyncpa [#allocation6], 0 }
   0x5   :  { %17 = vsyncpa [#allocation4], 0 }
   0x6   :  { %19 = vsyncpa [#allocation4 + $0x1], 0  ;;  %s3615_s13 = smov 0   ;;  %s3617_s14 = smov 0  }
   0x7   :  { %s3619_s15 = smov 0   ;;  %s3621_s16 = smov 0  }
   0x8 LB: > { %3868 = sst [smem:[#allocation12_spill]] %s3549_s15  ;;  %s3636_s17 = sadd.s32 4294967295, %s3553_s16   ;;  %s3553_s16 = sphi %s3621_s16, %s3892_s16   ;;  %s3549_s15 = sphi %s3619_s15, %s3889_s15   ;;  %s3545_s14 = sphi %s3617_s14, %s3891_s14   ;;  %s3541_s13 = sphi %s3615_s13, %s3890_s13  }
   0x9   : > { %s2394_s18 = sadd.s32 4294967294, %s3553_s16   ;;  %s3640_s19 = sadd.s32 1, %s3553_s16  }
   0xa   : > { %s252_s20 = sadd.s32 1, %s3549_s15  ;;  %s249_s21 = ssub.s32 %s3553_s16, %s3640_s19 }
   0xb   : > { %p262_p0 = scmp.ne.s32.totalorder %s3549_s15, %s3545_s14  ;;  %p250_p1 = scmp.eq.s32.totalorder %s249_s21, 0 }
   0xc   : > { %p263_p2 = scmp.eq.s32.totalorder %s3636_s17, 1  ;;  %p268_p3 = scmp.ne.s32.totalorder %s3545_s14, %s3541_s13 }
   0xd   : > { %p269_p4 = scmp.eq.s32.totalorder %s2394_s18, 1  ;;  %p2395_p7 = scmp.ge.s32.totalorder %s3553_s16, 1 }
   0xe   : > { %s3651_s22 = scalar_select %p250_p1, %s3549_s15, %s252_s20  }
   0xf   : > { %p3653_p5 = por %p263_p2, %p262_p0  ;;  %p3657_p6 = por %p269_p4, %p268_p3 }
  0x10   : > { %3869 = sst [smem:[#allocation13_spill]] %s3651_s22  ;;  %p276_p8 = scmp.lt.s32.totalorder %s3553_s16, 3 }
  0x11   : > { %p3323_p9 = scmp.eq.s32.totalorder %s3636_s17, 0  ;;  %s3873_s6 = sld [smem:[#allocation15_spill]] }
  0x12   : > { %p3664_p10 = pnand %p2395_p7, %p276_p8  ;;  %s3874_s4 = sld [smem:[#allocation14_spill]] }
  0x13   : > { %s3555_s18 = smov [#allocation5]   ;;  %s3556_s21 = smov 64  }
  0x14   : > { %p3309_p11 = pneg %p3664_p10  ;;  %s312_s20 = sshll.u32 %s3555_s18, 4  ;;  %s313_s20 = int_to_ptr.vmem [resolvable:$true] %s312_s20 }
  0x15   : > { %s3557_s26 = smov 4   ;;  %s3558_s27 = smov [#allocation2]  }
  0x16   : > { %p3678_p12 = pnand %p3323_p9, %p3309_p11  ;;  %s3559_s22 = smov [#allocation7]  }
  0x17   : > { %s310_s28 = sshll.u32 %s3873_s6, 4  ;;  %s295_s6 = sshll.u32 %s3558_s27, 4  ;;  %s311_s28 = int_to_ptr.hbm [resolvable:$true] %s310_s28  ;;  %s296_s6 = int_to_ptr.vmem [resolvable:$true] %s295_s6 }
  0x18   : > { %s293_s11 = sshll.u32 %s3874_s4, 4  ;;  %s327_s4 = sshll.u32 %s3862_s8, 4  ;;  %s294_s11 = int_to_ptr.hbm [resolvable:$true] %s293_s11  ;;  %s328_s4 = int_to_ptr.hbm [resolvable:$true] %s327_s4 }
  0x19   : > { %3315 = dma.hbm_to_vmem [thread:$0]  (!%p3678_p12), %s311_s28, 12288, %s313_s20, [#allocation6], %s3556_s21, %s3556_s21, %s3557_s26  }
  0x1a   : > { %3312 = dma.hbm_to_vmem [thread:$0]  (!%p3678_p12), %s294_s11, 12288, %s296_s6, [#allocation3], %s3556_s21, %s3556_s21, %s3557_s26  }
  0x1b   : > { %s329_s15 = sshll.u32 %s3559_s22, 4  ;;  %362 = sbr.rel (%p3664_p10) target bundleno = 1461 (0x5b5), region = 60  ;;  %s330_s15 = int_to_ptr.vmem [resolvable:$true] %s329_s15 }
  0x1c   : > { %3318 = dma.hbm_to_vmem [thread:$0]  (!%p3678_p12), %s328_s4, 4096, %s330_s15, [#allocation6], %s3556_s21, %s3556_s21, %s3557_s26  }
  0x20   : > { %3528 = dma.done.wait (%p3323_p9), [#allocation3], 12288  }
  0x21   : > { %3530 = vsyncadd (%p3323_p9), [#allocation3], 4294955008 }
  0x22   : > { %3532 = dma.done.wait (%p3323_p9), [#allocation6], 16384  }
  0x23   : > { %3534 = vsyncadd (%p3323_p9), [#allocation6], 4294950912  ;;  %p414_p13 = scmp.lt.s32.totalorder %s3636_s17, 1  ;;  %vm440_vm0 = vcmask 1042432   ;;  %v431_v0 = vld [vmem:[%s3856_s2] sm:$0x7]  ;;  %v484_v41 = vlaneseq }
  0x24   : > { %v442_v3 = vsel %vm440_vm0, %v431_v0, 0  ;;  %v3134_v4 = vld [vmem:[#allocation2 + $0x78] sm:$0xff]  ;;  %vm436_vm3 = vcmask 48128   ;;  %v3133_v10 = vld [vmem:[#allocation2 + $0x70] sm:$0xff]  ;;  %v3132_v14 = vld [vmem:[#allocation2 + $0x68] sm:$0xff]  ;;  %s411_s26 = sand.u32 1, %s3545_s14  }
  0x25   : > { %s415_s6 = scalar_select %p414_p13, %s3636_s17, 1  ;;  %v3142_v5 = vld [vmem:[#allocation2 + $0x38] sm:$0xff]  ;;  %451 = vmatpush.bf16.msra.mxu0 %v442_v3  ;;  %618 = vmatpush.bf16.msra.mxu2 %v3134_v4  ;;  %v3141_v12 = vld [vmem:[#allocation2 + $0x30] sm:$0xff]  ;;  %v3140_v15 = vld [vmem:[#allocation2 + $0x28] sm:$0xff]  ;;  %v3721_v42 = vshrl.u32 %v484_v41, 7 }
  0x26   : > { %v3150_v6 = vld [vmem:[#allocation2 + $0xb8] sm:$0xff]  ;;  %557 = vmatpush.bf16.msra.mxu1 %v3142_v5  ;;  %v3149_v13 = vld [vmem:[#allocation2 + $0xb0] sm:$0xff]  ;;  %v3148_v16 = vld [vmem:[#allocation2 + $0xa8] sm:$0xff]  ;;  %s2404_s27 = sshll.u32 %s411_s26, 3  ;;  %s3124_s29 = sshll.u32 %s3636_s17, 3 }
  0x27   : > { %s2405_s4 = sshll.u32 %s415_s6, 3  ;;  %697 = vmatpush.bf16.msra.mxu3 %v3150_v6  ;;  %v3131_v17 = vld [vmem:[#allocation2 + $0x60] sm:$0xff]  ;;  %v3130_v20 = vld [vmem:[#allocation2 + $0x58] sm:$0xff]  ;;  %v3129_v23 = vld [vmem:[#allocation2 + $0x50] sm:$0xff]  ;;  %vm486_vm4 = vcmp.ge.s32.totalorder %v3721_v42, 1  ;;  %vm489_vm5 = vcmp.lt.s32.totalorder %v3721_v42, 7  ;;  %s2287_s28 = scalar_lea.hbm %s3864_s10, %s3124_s29 }
  0x28   : > { %s417_s25 = scalar_lea.vmem %s3854_s0, %s2405_s4  ;;  %s421_s12 = scalar_lea.vmem %s3855_s1, %s2405_s4  ;;  %v3139_v18 = vld [vmem:[#allocation2 + $0x20] sm:$0xff]  ;;  %v3138_v21 = vld [vmem:[#allocation2 + $0x18] sm:$0xff]  ;;  %v3137_v24 = vld [vmem:[#allocation2 + $0x10] sm:$0xff]  ;;  %vm999_vm8 = vcmp.ge.s32.totalorder %v3721_v42, 2  ;;  %vm1002_vm9 = vcmp.lt.s32.totalorder %v3721_v42, 6  ;;  %vm1516_vm12 = vcmp.ge.s32.totalorder %v3721_v42, 4 }
  0x29   : > { %v423_v1 = vld [vmem:[%s417_s25] sm:$0xff]  ;;  %619 = vmatpush.bf16.msra.mxu2 %v3133_v10  ;;  %v3146_v22 = vld [vmem:[#allocation2 + $0x98] sm:$0xff]  ;;  %v3145_v25 = vld [vmem:[#allocation2 + $0x90] sm:$0xff]  ;;  %vm1519_vm13 = vcmp.lt.s32.totalorder %v3721_v42, 4  ;;  %s413_s11 = scalar_lea.vmem [#allocation8], %s2404_s27  ;;  %s2291_s18 = sshll.u32 %s2287_s28, 4  ;;  %s2292_s18 = int_to_ptr.hbm [resolvable:$true] %s2291_s18 }
  0x2a   : > { %v424_v2 = vld [vmem:[%s421_s12] sm:$0xff]  ;;  %vm425_vm1 = vcmp.ne.f32.partialorder %v423_v1, %v423_v1  ;;  %558 = vmatpush.bf16.msra.mxu1 %v3141_v12  ;;  %v3128_v26 = vld [vmem:[#allocation2 + $0x48] sm:$0xff]  ;;  %vm3726_vm6 = vmpackc.low %vm486_vm4, %vm486_vm4  ;;  %s2289_s12 = sshll.u32 %s413_s11, 4  ;;  %s2277_s17 = scalar_lea.sflag [#allocation4], %s411_s26  ;;  %s2290_s12 = int_to_ptr.vmem [resolvable:$true] %s2289_s12 }
  0x2b   : > { %vm427_vm2 = vcmp.ne.f32.partialorder %v424_v2, %v424_v2  ;;  %v426_v7 = vsel %vm425_vm1, 0.0, %v423_v1  ;;  %698 = vmatpush.bf16.msra.mxu3 %v3149_v13  ;;  %v3147_v19 = vld [vmem:[#allocation2 + $0xa0] sm:$0xff]  ;;  %v3136_v27 = vld [vmem:[#allocation2 + $0x8] sm:$0xff]  ;;  %vm3730_vm7 = vmpackc.low %vm489_vm5, %vm489_vm5  ;;  %s3497_s20 = sshra.s32 %s2292_s18, 4  ;;  %s3503_s27 = scalar_lea.hbm %s3864_s10, 16  ;;  %s3498_s20 = int_to_ptr.hbm [resolvable:$true] %s3497_s20 }
  0x2c   : > { %v428_v8 = vsel %vm427_vm2, 0.0, %v424_v2  ;;  %v3144_v28 = vld [vmem:[#allocation2 + $0x88] sm:$0xff]  ;;  %v3127_v29 = vld [vmem:[#allocation2 + $0x40] sm:$0xff]  ;;  %v3158_v54 = vld [vmem:[#allocation5 + $0x78] sm:$0xff]  ;;  %s3499_s21 = scalar_lea.hbm %s3498_s20, 8  ;;  %p3504_p3 = scmp.lt.s32.totalorder %s3498_s20, %s3864_s10 }
  0x2d   : > { %v429_v9 = vmul.f32 %v428_v8, %v426_v7  ;;  %620 = vmatpush.bf16.msra.mxu2 %v3132_v14  ;;  %v3135_v30 = vld [vmem:[#allocation2] sm:$0xff]  ;;  %v3166_v55 = vld [vmem:[#allocation5 + $0x38] sm:$0xff]  ;;  %v3157_v57 = vld [vmem:[#allocation5 + $0x70] sm:$0xff]  ;;  %p3500_p0 = scmp.ne.s32.totalorder %s3498_s20, %s3499_s21  ;;  %p3505_p4 = scmp.lt.s32.totalorder %s3503_s27, %s3499_s21 }
  0x2e   : > { %559 = vmatpush.bf16.msra.mxu1 %v3140_v15  ;;  %v3143_v31 = vld [vmem:[#allocation2 + $0x80] sm:$0xff]  ;;  %v3174_v56 = vld [vmem:[#allocation5 + $0xb8] sm:$0xff]  ;;  %812 = vmatpush.bf16.msrb.mxu0 %v3166_v55  ;;  %v3165_v58 = vld [vmem:[#allocation5 + $0x30] sm:$0xff] }
  0x2f   : > { %v430_v11 = vpack.c.bf16 %v429_v9, %v429_v9  ;;  %699 = vmatpush.bf16.msra.mxu3 %v3148_v16  ;;  %v3367_v32 = vld [vmem:[%s3857_s3] ss:$0 sm:$0xff]  ;;  %v3173_v59 = vld [vmem:[#allocation5 + $0xb0] sm:$0xff]  ;;  %v3156_v60 = vld [vmem:[#allocation5 + $0x68] sm:$0xff]  ;;  %p3501_p1 = pnand %p3500_p0, %p3653_p5  ;;  %p3506_p7 = por %p3505_p4, %p3504_p3 }
  0x30   : > { %v3164_v61 = vld [vmem:[#allocation5 + $0x28] sm:$0xff]  ;;  %v3155_v63 = vld [vmem:[#allocation5 + $0x60] sm:$0xff]  ;;  %v3154_v2 = vld [vmem:[#allocation5 + $0x58] sm:$0xff] }
  0x31   : > { %2407 = vmatmul.msk.bf16.vlgmr.msra.gmra.mxu0 %vm436_vm3, %v430_v11  ;;  %621 = vmatpush.bf16.msra.mxu2 %v3131_v17  ;;  %v3172_v62 = vld [vmem:[#allocation5 + $0xa8] sm:$0xff]  ;;  %v3163_v0 = vld [vmem:[#allocation5 + $0x20] sm:$0xff]  ;;  %v3162_v3 = vld [vmem:[#allocation5 + $0x18] sm:$0xff]  ;;  %p3502_p2 = pneg %p3501_p1 }
  0x32   : > { %560 = vmatpush.bf16.msra.mxu1 %v3139_v18  ;;  %813 = vmatpush.bf16.msrb.mxu0 %v3165_v58  ;;  %v3171_v1 = vld [vmem:[#allocation5 + $0xa0] sm:$0xff]  ;;  %v3170_v4 = vld [vmem:[#allocation5 + $0x98] sm:$0xff]  ;;  %v3153_v5 = vld [vmem:[#allocation5 + $0x50] sm:$0xff] }
  0x33   : > { %700 = vmatpush.bf16.msra.mxu3 %v3147_v19  ;;  %v3161_v6 = vld [vmem:[#allocation5 + $0x10] sm:$0xff]  ;;  %v3152_v8 = vld [vmem:[#allocation5 + $0x48] sm:$0xff]  ;;  %v3151_v11 = vld [vmem:[#allocation5 + $0x40] sm:$0xff]  ;;  %p3507_p8 = pnand %p3506_p7, %p3502_p2 }
  0x34   : > { %v3169_v7 = vld [vmem:[#allocation5 + $0x90] sm:$0xff]  ;;  %v3160_v9 = vld [vmem:[#allocation5 + $0x8] sm:$0xff]  ;;  %v3159_v12 = vld [vmem:[#allocation5] sm:$0xff] }
  0x35   : > { %622 = vmatpush.bf16.msra.mxu2 %v3130_v20  ;;  %v3168_v10 = vld [vmem:[#allocation5 + $0x88] sm:$0xff]  ;;  %v3167_v13 = vld [vmem:[#allocation5 + $0x80] sm:$0xff]  ;;  %v3198_v41 = vld [vmem:[#allocation2 + $0x178] sm:$0xff] }
  0x36   : > { %561 = vmatpush.bf16.msra.mxu1 %v3138_v21  ;;  %814 = vmatpush.bf16.msrb.mxu0 %v3164_v61  ;;  %v3368_v17 = vld [vmem:[%s3859_s5] ss:$0 sm:$0xff]  ;;  %v3177_v55 = vld [vmem:[#allocation2 + $0x110] sm:$0xff]  ;;  %v3176_v58 = vld [vmem:[#allocation2 + $0x108] sm:$0xff] }
  0x37   : > { %701 = vmatpush.bf16.msra.mxu3 %v3146_v22  ;;  %v3179_v49 = vld [vmem:[#allocation2 + $0x120] sm:$0xff]  ;;  %vm3758_vm10 = vmpackc.low %vm999_vm8, %vm999_vm8  ;;  %v3262_v42 = vld [vmem:[#allocation5 + $0x1b8] sm:$0xff] }
  0x38   : > { %v3195_v51 = vld [vmem:[#allocation2 + $0x160] sm:$0xff]  ;;  %vm3762_vm11 = vmpackc.low %vm1002_vm9, %vm1002_vm9 }
  0x39   : > { %623 = vmatpush.bf16.msra.mxu2 %v3129_v23  ;;  %v3175_v61 = vld [vmem:[#allocation2 + $0x100] sm:$0xff]  ;;  %vm3790_vm14 = vmpackc.low %vm1516_vm12, %vm1516_vm12 }
  0x3a   : > { %562 = vmatpush.bf16.msra.mxu1 %v3137_v24  ;;  %815 = vmatpush.bf16.msrb.mxu0 %v3163_v0  ;;  %v3191_v0 = vld [vmem:[#allocation2 + $0x140] sm:$0xff]  ;;  %vm3794_vm15 = vmpackc.low %vm1519_vm13, %vm1519_vm13 }
  0x3b   : > { %702 = vmatpush.bf16.msra.mxu3 %v3145_v25 }
  0x3d   : > { %624 = vmatpush.bf16.msra.mxu2 %v3128_v26 }
  0x3e   : > { %563 = vmatpush.bf16.msra.mxu1 %v3136_v27  ;;  %816 = vmatpush.bf16.msrb.mxu0 %v3162_v3  ;;  %v3369_v3 = vld [vmem:[%s3861_s7] ss:$0 sm:$0xff] }
  0x3f   : > { %703 = vmatpush.bf16.msra.mxu3 %v3144_v28 }
  0x41   : > { %625 = vmatpush.bf16.msra.mxu2 %v3127_v29 }
  0x42   : > { %564 = vmatpush.bf16.msra.mxu1 %v3135_v30  ;;  %817 = vmatpush.bf16.msrb.mxu0 %v3161_v6 }
  0x43   : > { %704 = vmatpush.bf16.msra.mxu3 %v3143_v31 }
  0x45   : > { %952 = vmatpush.bf16.msrb.mxu2 %v3174_v56  ;;  %v3185_v56 = vld [vmem:[#allocation2 + $0xd0] sm:$0xff] }
  0x46   : > { %873 = vmatpush.bf16.msrb.mxu1 %v3158_v54  ;;  %818 = vmatpush.bf16.msrb.mxu0 %v3160_v9  ;;  %v3194_v54 = vld [vmem:[#allocation2 + $0x158] sm:$0xff] }
  0x49   : > { %953 = vmatpush.bf16.msrb.mxu2 %v3173_v59  ;;  %v3184_v59 = vld [vmem:[#allocation2 + $0xc8] sm:$0xff] }
  0x4a   : > { %874 = vmatpush.bf16.msrb.mxu1 %v3157_v57  ;;  %819 = vmatpush.bf16.msrb.mxu0 %v3159_v12  ;;  %v3193_v57 = vld [vmem:[#allocation2 + $0x150] sm:$0xff] }
  0x4d   : > { %954 = vmatpush.bf16.msrb.mxu2 %v3172_v62 }
  0x4e   : > { %875 = vmatpush.bf16.msrb.mxu1 %v3156_v60  ;;  %v3192_v60 = vld [vmem:[#allocation2 + $0x148] sm:$0xff] }
  0x51   : > { %955 = vmatpush.bf16.msrb.mxu2 %v3171_v1 }
  0x52   : > { %876 = vmatpush.bf16.msrb.mxu1 %v3155_v63  ;;  %v3183_v63 = vld [vmem:[#allocation2 + $0xc0] sm:$0xff] }
  0x55   : > { %956 = vmatpush.bf16.msrb.mxu2 %v3170_v4 }
  0x56   : > { %877 = vmatpush.bf16.msrb.mxu1 %v3154_v2 }
  0x59   : > { %957 = vmatpush.bf16.msrb.mxu2 %v3169_v7 }
  0x5a   : > { %878 = vmatpush.bf16.msrb.mxu1 %v3153_v5 }
  0x5d   : > { %958 = vmatpush.bf16.msrb.mxu2 %v3168_v10 }
  0x5e   : > { %879 = vmatpush.bf16.msrb.mxu1 %v3152_v8 }
  0x61   : > { %959 = vmatpush.bf16.msrb.mxu2 %v3167_v13 }
  0x62   : > { %880 = vmatpush.bf16.msrb.mxu1 %v3151_v11 }
  0xae   : > { %v453_v33 = vpop.f32.mrf.mxu0 }
  0xaf   : > { %v3715_v34 = vadd.f32 %v3367_v32, %v453_v33 }
  0xb1   : > { %v458_v35 = vmul.f32 0.044715, %v3715_v34  ;;  %v457_v44 = vmul.f32 0.5, %v3715_v34 }
  0xb3   : > { %v459_v36 = vmul.f32 %v458_v35, %v3715_v34 }
  0xb5   : > { %v460_v37 = vmul.f32 %v459_v36, %v3715_v34 }
  0xb6   : > { %v455_v38 = vpop.f32.mrf.mxu0 }
  0xb7   : > { %v461_v39 = vadd.f32 %v460_v37, %v3715_v34 }
  0xb9   : > { %v462_v40 = vmul.f32 0.7978846, %v461_v39  ;;  %v3182_v39 = vld [vmem:[#allocation2 + $0x138] sm:$0xff] }
  0xba   : > { %1132 = vmatpush.bf16.msra.mxu0 %v3182_v39  ;;  %v3202_v39 = vld [vmem:[#allocation5 + $0x118] sm:$0xff] }
  0xbb   : > { %3377 = vtanh.f32 %v462_v40  ;;  %v3190_v40 = vld [vmem:[#allocation2 + $0xf8] sm:$0xff] }
  0xbc   : > { %1071 = vmatpush.bf16.msrb.mxu3 %v3190_v40  ;;  %v3210_v40 = vld [vmem:[#allocation5 + $0xd8] sm:$0xff] }
  0xc1   : > { %v3378_v43 = vpop.eup %3377 }
  0xc2   : > { %v464_v45 = vadd.f32 1.0, %v3378_v43  ;;  %v3181_v43 = vld [vmem:[#allocation2 + $0x130] sm:$0xff] }
  0xc3   : > { %1133 = vmatpush.bf16.msra.mxu0 %v3181_v43  ;;  %v3201_v43 = vld [vmem:[#allocation5 + $0x110] sm:$0xff] }
  0xc4   : > { %v465_v46 = vmul.f32 %v464_v45, %v457_v44  ;;  %v3189_v44 = vld [vmem:[#allocation2 + $0xf0] sm:$0xff] }
  0xc5   : > { %v3197_v45 = vld [vmem:[#allocation2 + $0x170] sm:$0xff]  ;;  %1072 = vmatpush.bf16.msrb.mxu3 %v3189_v44 }
  0xc6   : > { %v466_v47 = vpack.c.bf16 %v465_v46, %v465_v46  ;;  %v487_v48 = vrot.slane %v465_v46, 7  ;;  %v490_v50 = vrot.slane %v465_v46, 1  ;;  %v3180_v46 = vld [vmem:[#allocation2 + $0x128] sm:$0xff]  ;;  %v3209_v44 = vld [vmem:[#allocation5 + $0xd0] sm:$0xff] }
  0xc7   : > { %1134 = vmatpush.bf16.msra.mxu0 %v3180_v46  ;;  %v3200_v46 = vld [vmem:[#allocation5 + $0x108] sm:$0xff] }
  0xc8   : > { %626 = vmatmul.bf16.vlgmr.msra.gmra.mxu2 %v466_v47  ;;  %v2441_v52 = vpack.c.bf16 %v487_v48, %v487_v48  ;;  %v2508_v53 = vpack.c.bf16 %v490_v50, %v490_v50  ;;  %v3188_v47 = vld [vmem:[#allocation2 + $0xe8] sm:$0xff]  ;;  %v3187_v50 = vld [vmem:[#allocation2 + $0xe0] sm:$0xff] }
  0xc9   : > { %v3196_v48 = vld [vmem:[#allocation2 + $0x168] sm:$0xff]  ;;  %1073 = vmatpush.bf16.msrb.mxu3 %v3188_v47 }
  0xca   : > { %2442 = vmatmul.msk.bf16.vlgmr.msra.gmra.mxu1 %vm3726_vm6, %v2441_v52  ;;  %2509 = vmatmul.msk.bf16.vlgmr.msra.gmra.mxu3 %vm3730_vm7, %v2508_v53  ;;  %v3178_v52 = vld [vmem:[#allocation2 + $0x118] sm:$0xff]  ;;  %v3208_v47 = vld [vmem:[#allocation5 + $0xc8] sm:$0xff] }
  0xcb   : > { %1211 = vmatpush.bf16.msra.mxu1 %v3198_v41  ;;  %1135 = vmatpush.bf16.msra.mxu0 %v3179_v49  ;;  %v3186_v53 = vld [vmem:[#allocation2 + $0xd8] sm:$0xff]  ;;  %v3199_v49 = vld [vmem:[#allocation5 + $0x100] sm:$0xff] }
  0xcc   : > { %v3218_v41 = vld [vmem:[#allocation5 + $0x158] sm:$0xff] }
  0xcd   : > { %1074 = vmatpush.bf16.msrb.mxu3 %v3187_v50 }
  0xcf   : > { %1212 = vmatpush.bf16.msra.mxu1 %v3197_v45  ;;  %1136 = vmatpush.bf16.msra.mxu0 %v3178_v52  ;;  %v3217_v45 = vld [vmem:[#allocation5 + $0x150] sm:$0xff]  ;;  %v3215_v52 = vld [vmem:[#allocation5 + $0x140] sm:$0xff] }
  0xd1   : > { %1075 = vmatpush.bf16.msrb.mxu3 %v3186_v53 }
  0xd3   : > { %1213 = vmatpush.bf16.msra.mxu1 %v3196_v48  ;;  %1137 = vmatpush.bf16.msra.mxu0 %v3177_v55  ;;  %v3216_v48 = vld [vmem:[#allocation5 + $0x148] sm:$0xff] }
  0xd5   : > { %1076 = vmatpush.bf16.msrb.mxu3 %v3185_v56 }
  0xd7   : > { %1214 = vmatpush.bf16.msra.mxu1 %v3195_v51  ;;  %1138 = vmatpush.bf16.msra.mxu0 %v3176_v58  ;;  %v3207_v51 = vld [vmem:[#allocation5 + $0xc0] sm:$0xff] }
  0xd9   : > { %1077 = vmatpush.bf16.msrb.mxu3 %v3184_v59 }
  0xdb   : > { %1215 = vmatpush.bf16.msra.mxu1 %v3194_v54  ;;  %1139 = vmatpush.bf16.msra.mxu0 %v3175_v61 }
  0xdd   : > { %1078 = vmatpush.bf16.msrb.mxu3 %v3183_v63 }
  0xdf   : > { %1216 = vmatpush.bf16.msra.mxu1 %v3193_v57  ;;  %v3370_v57 = vld [vmem:[%s3859_s5 + $0x1] ss:$0 sm:$0xff] }
  0xe3   : > { %1217 = vmatpush.bf16.msra.mxu1 %v3192_v60 }
  0xe7   : > { %1218 = vmatpush.bf16.msra.mxu1 %v3191_v0 }
 0x147   : > { %v566_v14 = vpop.f32.mrf.mxu1 }
 0x14b   : > { %v627_v15 = vpop.f32.mrf.mxu2 }
 0x14c   : > { %v628_v16 = vadd.f32 %v627_v15, %v566_v14 }
 0x14d   : > { %v706_v18 = vpop.f32.mrf.mxu3 }
 0x14e   : > { %v710_v19 = vadd.f32 %v706_v18, %v628_v16 }
 0x14f   : > { %v568_v20 = vpop.f32.mrf.mxu1 }
 0x150   : > { %v715_v21 = vadd.f32 %v3368_v17, %v710_v19 }
 0x152   : > { %v717_v22 = vmul.f32 0.044715, %v715_v21  ;;  %v716_v30 = vmul.f32 0.5, %v715_v21 }
 0x153   : > { %v629_v23 = vpop.f32.mrf.mxu2 }
 0x154   : > { %v718_v24 = vmul.f32 %v717_v22, %v715_v21  ;;  %v3243_v23 = vld [vmem:[#allocation2 + $0x220] sm:$0xff] }
 0x155   : > { %v708_v25 = vpop.f32.mrf.mxu3 }
 0x156   : > { %v719_v26 = vmul.f32 %v718_v24, %v715_v21 }
 0x158   : > { %v720_v27 = vadd.f32 %v719_v26, %v715_v21  ;;  %v3206_v26 = vld [vmem:[#allocation5 + $0x138] sm:$0xff]  ;;  %v3227_v21 = vld [vmem:[#allocation2 + $0x1e0] sm:$0xff] }
 0x159   : > { %1389 = vmatpush.bf16.msra.mxu3 %v3206_v26  ;;  %v3242_v26 = vld [vmem:[#allocation2 + $0x218] sm:$0xff] }
 0x15a   : > { %v721_v28 = vmul.f32 0.7978846, %v720_v27  ;;  %v3214_v27 = vld [vmem:[#allocation5 + $0xf8] sm:$0xff] }
 0x15b   : > { %1328 = vmatpush.bf16.msra.mxu2 %v3214_v27  ;;  %v3225_v27 = vld [vmem:[#allocation2 + $0x1d0] sm:$0xff] }
 0x15c   : > { %3379 = vtanh.f32 %v721_v28  ;;  %v3222_v28 = vld [vmem:[#allocation5 + $0x178] sm:$0xff] }
 0x162   : > { %v3380_v29 = vpop.eup %3379 }
 0x163   : > { %v723_v31 = vadd.f32 1.0, %v3380_v29  ;;  %v3205_v29 = vld [vmem:[#allocation5 + $0x130] sm:$0xff] }
 0x164   : > { %1390 = vmatpush.bf16.msra.mxu3 %v3205_v29  ;;  %v3241_v29 = vld [vmem:[#allocation2 + $0x210] sm:$0xff] }
 0x165   : > { %v724_v32 = vmul.f32 %v723_v31, %v716_v30  ;;  %v3213_v30 = vld [vmem:[#allocation5 + $0xf0] sm:$0xff] }
 0x166   : > { %v3221_v31 = vld [vmem:[#allocation5 + $0x170] sm:$0xff]  ;;  %1329 = vmatpush.bf16.msra.mxu2 %v3213_v30  ;;  %v3224_v30 = vld [vmem:[#allocation2 + $0x1c8] sm:$0xff] }
 0x167   : > { %v725_v33 = vpack.c.bf16 %v724_v32, %v724_v32  ;;  %v743_v35 = vrot.slane %v724_v32, 7  ;;  %v745_v36 = vrot.slane %v724_v32, 1  ;;  %v3204_v32 = vld [vmem:[#allocation5 + $0x128] sm:$0xff] }
 0x168   : > { %1391 = vmatpush.bf16.msra.mxu3 %v3204_v32  ;;  %v3240_v32 = vld [vmem:[#allocation2 + $0x208] sm:$0xff] }
 0x169   : > { %881 = vmatmul.bf16.vlgmr.msrb.gmra.mxu1 %v725_v33  ;;  %v2543_v37 = vpack.c.bf16 %v743_v35, %v743_v35  ;;  %v2610_v38 = vpack.c.bf16 %v745_v36, %v745_v36  ;;  %v3212_v33 = vld [vmem:[#allocation5 + $0xe8] sm:$0xff]  ;;  %v3203_v36 = vld [vmem:[#allocation5 + $0x120] sm:$0xff] }
 0x16a   : > { %v3220_v35 = vld [vmem:[#allocation5 + $0x168] sm:$0xff]  ;;  %1330 = vmatpush.bf16.msra.mxu2 %v3212_v33  ;;  %v3223_v33 = vld [vmem:[#allocation2 + $0x1c0] sm:$0xff] }
 0x16b   : > { %2544 = vmatmul.msk.bf16.vlgmr.msrb.gmra.mxu0 %vm3726_vm6, %v2543_v37  ;;  %2611 = vmatmul.msk.bf16.vlgmr.msrb.gmra.mxu2 %vm3730_vm7, %v2610_v38  ;;  %v3211_v37 = vld [vmem:[#allocation5 + $0xe0] sm:$0xff] }
 0x16c   : > { %1468 = vmatpush.bf16.msrb.mxu0 %v3222_v28  ;;  %1392 = vmatpush.bf16.msra.mxu3 %v3203_v36  ;;  %v3219_v38 = vld [vmem:[#allocation5 + $0x160] sm:$0xff]  ;;  %v3233_v28 = vld [vmem:[#allocation2 + $0x190] sm:$0xff] }
 0x16d   : > { %v3231_v36 = vld [vmem:[#allocation2 + $0x180] sm:$0xff] }
 0x16e   : > { %1331 = vmatpush.bf16.msra.mxu2 %v3211_v37  ;;  %v3239_v37 = vld [vmem:[#allocation2 + $0x200] sm:$0xff] }
 0x170   : > { %1469 = vmatpush.bf16.msrb.mxu0 %v3221_v31  ;;  %1393 = vmatpush.bf16.msra.mxu3 %v3202_v39  ;;  %v3232_v31 = vld [vmem:[#allocation2 + $0x188] sm:$0xff] }
 0x172   : > { %1332 = vmatpush.bf16.msra.mxu2 %v3210_v40 }
 0x174   : > { %1470 = vmatpush.bf16.msrb.mxu0 %v3220_v35  ;;  %1394 = vmatpush.bf16.msra.mxu3 %v3201_v43 }
 0x176   : > { %1333 = vmatpush.bf16.msra.mxu2 %v3209_v44 }
 0x178   : > { %1471 = vmatpush.bf16.msrb.mxu0 %v3219_v38  ;;  %1395 = vmatpush.bf16.msra.mxu3 %v3200_v46 }
 0x17a   : > { %1334 = vmatpush.bf16.msra.mxu2 %v3208_v47 }
 0x17c   : > { %1472 = vmatpush.bf16.msrb.mxu0 %v3218_v41  ;;  %1396 = vmatpush.bf16.msra.mxu3 %v3199_v49  ;;  %v3371_v41 = vld [vmem:[%s3861_s7 + $0x1] ss:$0 sm:$0xff] }
 0x17e   : > { %1335 = vmatpush.bf16.msra.mxu2 %v3207_v51 }
 0x180   : > { %1473 = vmatpush.bf16.msrb.mxu0 %v3217_v45 }
 0x184   : > { %1474 = vmatpush.bf16.msrb.mxu0 %v3216_v48 }
 0x188   : > { %1475 = vmatpush.bf16.msrb.mxu0 %v3215_v52 }
 0x1e6   : > { %v882_v62 = vpop.f32.mrf.mxu1 }
 0x1e8   : > { %v821_v1 = vpop.f32.mrf.mxu0 }
 0x1e9   : > { %v883_v2 = vadd.f32 %v882_v62, %v821_v1 }
 0x1ee   : > { %v884_v4 = vpop.f32.mrf.mxu1  ;;  %v961_v5 = vpop.f32.mrf.mxu2 }
 0x1ef   : > { %v965_v6 = vadd.f32 %v961_v5, %v883_v2 }
 0x1f0   : > { %v823_v7 = vpop.f32.mrf.mxu0 }
 0x1f1   : > { %v970_v8 = vadd.f32 %v3369_v3, %v965_v6 }
 0x1f3   : > { %v3749_v9 = vadd.f32 %v970_v8, %v3715_v34 }
 0x1f5   : > { %v973_v10 = vmul.f32 0.044715, %v3749_v9  ;;  %v972_v17 = vmul.f32 0.5, %v3749_v9 }
 0x1f6   : > { %v963_v11 = vpop.f32.mrf.mxu2 }
 0x1f7   : > { %v974_v12 = vmul.f32 %v973_v10, %v3749_v9 }
 0x1f9   : > { %v975_v13 = vmul.f32 %v974_v12, %v3749_v9 }
 0x1fb   : > { %v976_v14 = vadd.f32 %v975_v13, %v3749_v9  ;;  %v3230_v13 = vld [vmem:[#allocation2 + $0x1f8] sm:$0xff] }
 0x1fc   : > { %1648 = vmatpush.bf16.msrb.mxu2 %v3230_v13  ;;  %v3249_v13 = vld [vmem:[#allocation5 + $0x1d0] sm:$0xff] }
 0x1fd   : > { %v977_v15 = vmul.f32 0.7978846, %v976_v14  ;;  %v3238_v14 = vld [vmem:[#allocation2 + $0x1b8] sm:$0xff] }
 0x1fe   : > { %1587 = vmatpush.bf16.msrb.mxu1 %v3238_v14  ;;  %v3257_v14 = vld [vmem:[#allocation5 + $0x190] sm:$0xff] }
 0x1ff   : > { %3381 = vtanh.f32 %v977_v15  ;;  %v3246_v15 = vld [vmem:[#allocation2 + $0x238] sm:$0xff] }
 0x205   : > { %v3382_v16 = vpop.eup %3381 }
 0x206   : > { %v979_v18 = vadd.f32 1.0, %v3382_v16  ;;  %v3229_v16 = vld [vmem:[#allocation2 + $0x1f0] sm:$0xff] }
 0x207   : > { %1649 = vmatpush.bf16.msrb.mxu2 %v3229_v16  ;;  %v3248_v16 = vld [vmem:[#allocation5 + $0x1c8] sm:$0xff] }
 0x208   : > { %v980_v19 = vmul.f32 %v979_v18, %v972_v17  ;;  %v3237_v17 = vld [vmem:[#allocation2 + $0x1b0] sm:$0xff] }
 0x209   : > { %v3245_v18 = vld [vmem:[#allocation2 + $0x230] sm:$0xff]  ;;  %1588 = vmatpush.bf16.msrb.mxu1 %v3237_v17  ;;  %v3256_v17 = vld [vmem:[#allocation5 + $0x188] sm:$0xff] }
 0x20a   : > { %v981_v34 = vpack.c.bf16 %v980_v19, %v980_v19  ;;  %v1000_v20 = vrot.slane %v980_v19, 6  ;;  %v1003_v22 = vrot.slane %v980_v19, 2  ;;  %v3228_v19 = vld [vmem:[#allocation2 + $0x1e8] sm:$0xff] }
 0x20b   : > { %1650 = vmatpush.bf16.msrb.mxu2 %v3228_v19  ;;  %v3247_v19 = vld [vmem:[#allocation5 + $0x1c0] sm:$0xff] }
 0x20c   : > { %1140 = vmatmul.bf16.vlgmr.msra.gmra.mxu0 %v981_v34  ;;  %v2645_v24 = vpack.c.bf16 %v1000_v20, %v1000_v20  ;;  %v2712_v25 = vpack.c.bf16 %v1003_v22, %v1003_v22  ;;  %v3236_v34 = vld [vmem:[#allocation2 + $0x1a8] sm:$0xff]  ;;  %v3235_v22 = vld [vmem:[#allocation2 + $0x1a0] sm:$0xff] }
 0x20d   : > { %v3244_v20 = vld [vmem:[#allocation2 + $0x228] sm:$0xff]  ;;  %1589 = vmatpush.bf16.msrb.mxu1 %v3236_v34  ;;  %1843 = vmatpush.bf16.msra.mxu0 %v3262_v42  ;;  %v3255_v34 = vld [vmem:[#allocation5 + $0x180] sm:$0xff] }
 0x20e   : > { %2646 = vmatmul.msk.bf16.vlgmr.msrb.gmra.mxu3 %vm3758_vm10, %v2645_v24  ;;  %2713 = vmatmul.msk.bf16.vlgmr.msra.gmra.mxu1 %vm3762_vm11, %v2712_v25  ;;  %v3226_v24 = vld [vmem:[#allocation2 + $0x1d8] sm:$0xff] }
 0x20f   : > { %1727 = vmatpush.bf16.msrb.mxu3 %v3246_v15  ;;  %1651 = vmatpush.bf16.msrb.mxu2 %v3227_v21  ;;  %v3234_v25 = vld [vmem:[#allocation2 + $0x198] sm:$0xff]  ;;  %v3265_v15 = vld [vmem:[#allocation5 + $0x210] sm:$0xff] }
 0x211   : > { %1590 = vmatpush.bf16.msrb.mxu1 %v3235_v22 }
 0x213   : > { %1728 = vmatpush.bf16.msrb.mxu3 %v3245_v18  ;;  %1652 = vmatpush.bf16.msrb.mxu2 %v3226_v24  ;;  %v3264_v18 = vld [vmem:[#allocation5 + $0x208] sm:$0xff] }
 0x215   : > { %1591 = vmatpush.bf16.msrb.mxu1 %v3234_v25  ;;  %v3372_v25 = vld [vmem:[%s3859_s5 + $0x2] ss:$0 sm:$0xff] }
 0x217   : > { %1729 = vmatpush.bf16.msrb.mxu3 %v3244_v20  ;;  %1653 = vmatpush.bf16.msrb.mxu2 %v3225_v27  ;;  %v3263_v20 = vld [vmem:[#allocation5 + $0x200] sm:$0xff]  ;;  %v3277_v27 = vld [vmem:[#allocation7 + $0xf0] sm:$0xff] }
 0x219   : > { %1592 = vmatpush.bf16.msrb.mxu1 %v3233_v28 }
 0x21b   : > { %1730 = vmatpush.bf16.msrb.mxu3 %v3243_v23  ;;  %1654 = vmatpush.bf16.msrb.mxu2 %v3224_v30  ;;  %v3278_v23 = vld [vmem:[#allocation7 + $0xf8] sm:$0xff] }
 0x21d   : > { %1593 = vmatpush.bf16.msrb.mxu1 %v3232_v31  ;;  %v3276_v31 = vld [vmem:[#allocation7 + $0xe8] sm:$0xff] }
 0x21f   : > { %1731 = vmatpush.bf16.msrb.mxu3 %v3242_v26  ;;  %1655 = vmatpush.bf16.msrb.mxu2 %v3223_v33 }
 0x221   : > { %1594 = vmatpush.bf16.msrb.mxu1 %v3231_v36 }
 0x223   : > { %1732 = vmatpush.bf16.msrb.mxu3 %v3241_v29 }
 0x227   : > { %1733 = vmatpush.bf16.msrb.mxu3 %v3240_v32 }
 0x22b   : > { %1734 = vmatpush.bf16.msrb.mxu3 %v3239_v37  ;;  %v3275_v37 = vld [vmem:[#allocation7 + $0xe0] sm:$0xff] }
 0x289   : > { %v1141_v50 = vpop.f32.mrf.mxu0 }
 0x28b   : > { %v1220_v53 = vpop.f32.mrf.mxu1 }
 0x291   : > { %v1080_v54 = vpop.f32.mrf.mxu3  ;;  %v1143_v55 = vpop.f32.mrf.mxu0 }
 0x292   : > { %v1142_v56 = vadd.f32 %v1141_v50, %v1080_v54 }
 0x293   : > { %v1222_v58 = vpop.f32.mrf.mxu1 }
 0x294   : > { %v1224_v59 = vadd.f32 %v1220_v53, %v1142_v56 }
 0x296   : > { %v1230_v60 = vadd.f32 %v3370_v57, %v1224_v59  ;;  %v3280_v59 = vld [vmem:[#allocation2 + $0x288] sm:$0xff] }
 0x298   : > { %v1232_v61 = vmul.f32 0.044715, %v1230_v60  ;;  %v1231_v4 = vmul.f32 0.5, %v1230_v60 }
 0x299   : > { %v1082_v62 = vpop.f32.mrf.mxu3 }
 0x29a   : > { %v1233_v63 = vmul.f32 %v1232_v61, %v1230_v60  ;;  %v3254_v62 = vld [vmem:[#allocation5 + $0x1f8] sm:$0xff] }
 0x29b   : > { %1904 = vmatpush.bf16.msra.mxu1 %v3254_v62 }
 0x29c   : > { %v1234_v0 = vmul.f32 %v1233_v63, %v1230_v60  ;;  %v3270_v63 = vld [vmem:[#allocation5 + $0x238] sm:$0xff] }
 0x29e   : > { %v1235_v1 = vadd.f32 %v1234_v0, %v1230_v60  ;;  %v3253_v0 = vld [vmem:[#allocation5 + $0x1f0] sm:$0xff]  ;;  %v3279_v60 = vld [vmem:[#allocation2 + $0x280] sm:$0xff] }
 0x29f   : > { %1905 = vmatpush.bf16.msra.mxu1 %v3253_v0 }
 0x2a0   : > { %v1236_v2 = vmul.f32 0.7978846, %v1235_v1  ;;  %v3261_v1 = vld [vmem:[#allocation5 + $0x1b0] sm:$0xff] }
 0x2a1   : > { %1844 = vmatpush.bf16.msra.mxu0 %v3261_v1 }
 0x2a2   : > { %3383 = vtanh.f32 %v1236_v2  ;;  %v3269_v2 = vld [vmem:[#allocation5 + $0x230] sm:$0xff] }
 0x2a8   : > { %v3384_v3 = vpop.eup %3383 }
 0x2a9   : > { %v1238_v5 = vadd.f32 1.0, %v3384_v3  ;;  %v3252_v3 = vld [vmem:[#allocation5 + $0x1e8] sm:$0xff] }
 0x2aa   : > { %1906 = vmatpush.bf16.msra.mxu1 %v3252_v3 }
 0x2ab   : > { %v1239_v6 = vmul.f32 %v1238_v5, %v1231_v4  ;;  %v3260_v4 = vld [vmem:[#allocation5 + $0x1a8] sm:$0xff] }
 0x2ac   : > { %v3268_v5 = vld [vmem:[#allocation5 + $0x228] sm:$0xff]  ;;  %1845 = vmatpush.bf16.msra.mxu0 %v3260_v4 }
 0x2ad   : > { %v1240_v7 = vpack.c.bf16 %v1239_v6, %v1239_v6  ;;  %v1258_v8 = vrot.slane %v1239_v6, 6  ;;  %v1260_v10 = vrot.slane %v1239_v6, 2  ;;  %v3251_v6 = vld [vmem:[#allocation5 + $0x1e0] sm:$0xff] }
 0x2ae   : > { %1907 = vmatpush.bf16.msra.mxu1 %v3251_v6 }
 0x2af   : > { %1397 = vmatmul.bf16.vlgmr.msra.gmra.mxu3 %v1240_v7  ;;  %v2748_v11 = vpack.c.bf16 %v1258_v8, %v1258_v8  ;;  %v2815_v12 = vpack.c.bf16 %v1260_v10, %v1260_v10  ;;  %v3259_v7 = vld [vmem:[#allocation5 + $0x1a0] sm:$0xff]  ;;  %v3250_v10 = vld [vmem:[#allocation5 + $0x1d8] sm:$0xff] }
 0x2b0   : > { %v3267_v8 = vld [vmem:[#allocation5 + $0x220] sm:$0xff]  ;;  %1846 = vmatpush.bf16.msra.mxu0 %v3259_v7  ;;  %2075 = vmatpush.bf16.msra.mxu3 %v3278_v23  ;;  %v3288_v23 = vld [vmem:[#allocation5 + $0x288] sm:$0xff] }
 0x2b1   : > { %2749 = vmatmul.msk.bf16.vlgmr.msra.gmra.mxu2 %vm3758_vm10, %v2748_v11  ;;  %2816 = vmatmul.msk.bf16.vlgmr.msrb.gmra.mxu0 %vm3762_vm11, %v2815_v12  ;;  %v3258_v11 = vld [vmem:[#allocation5 + $0x198] sm:$0xff] }
 0x2b2   : > { %1983 = vmatpush.bf16.msra.mxu2 %v3270_v63  ;;  %v3266_v12 = vld [vmem:[#allocation5 + $0x218] sm:$0xff]  ;;  %1908 = vmatpush.bf16.msra.mxu1 %v3250_v10  ;;  %v3373_v63 = vld [vmem:[%s3861_s7 + $0x2] ss:$0 sm:$0xff] }
 0x2b4   : > { %1847 = vmatpush.bf16.msra.mxu0 %v3258_v11  ;;  %2076 = vmatpush.bf16.msra.mxu3 %v3277_v27  ;;  %v3375_v27 = vld [vmem:[%s3859_s5 + $0x3] ss:$0 sm:$0xff] }
 0x2b6   : > { %1984 = vmatpush.bf16.msra.mxu2 %v3269_v2  ;;  %1909 = vmatpush.bf16.msra.mxu1 %v3249_v13 }
 0x2b8   : > { %1848 = vmatpush.bf16.msra.mxu0 %v3257_v14  ;;  %2077 = vmatpush.bf16.msra.mxu3 %v3276_v31 }
 0x2ba   : > { %1985 = vmatpush.bf16.msra.mxu2 %v3268_v5  ;;  %1910 = vmatpush.bf16.msra.mxu1 %v3248_v16 }
 0x2bc   : > { %1849 = vmatpush.bf16.msra.mxu0 %v3256_v17  ;;  %2078 = vmatpush.bf16.msra.mxu3 %v3275_v37 }
 0x2be   : > { %1986 = vmatpush.bf16.msra.mxu2 %v3267_v8  ;;  %1911 = vmatpush.bf16.msra.mxu1 %v3247_v19  ;;  %v3294_v19 = vld [vmem:[#allocation5 + $0x2b8] sm:$0xff] }
 0x2c0   : > { %1850 = vmatpush.bf16.msra.mxu0 %v3255_v34  ;;  %v3293_v34 = vld [vmem:[#allocation5 + $0x2b0] sm:$0xff] }
 0x2c2   : > { %1987 = vmatpush.bf16.msra.mxu2 %v3266_v12 }
 0x2c6   : > { %1988 = vmatpush.bf16.msra.mxu2 %v3265_v15 }
 0x2ca   : > { %1989 = vmatpush.bf16.msra.mxu2 %v3264_v18 }
 0x2ce   : > { %1990 = vmatpush.bf16.msra.mxu2 %v3263_v20  ;;  %v3291_v20 = vld [vmem:[#allocation5 + $0x2a0] sm:$0xff] }
 0x32e   : > { %v1477_v35 = vpop.f32.mrf.mxu0 }
 0x332   : > { %v1398_v38 = vpop.f32.mrf.mxu3 }
 0x334   : > { %v1337_v39 = vpop.f32.mrf.mxu2 }
 0x335   : > { %v1399_v40 = vadd.f32 %v1398_v38, %v1337_v39 }
 0x336   : > { %v1479_v43 = vpop.f32.mrf.mxu0 }
 0x337   : > { %v1481_v44 = vadd.f32 %v1477_v35, %v1399_v40 }
 0x339   : > { %v1487_v45 = vadd.f32 %v3371_v41, %v1481_v44 }
 0x33a   : > { %v1400_v46 = vpop.f32.mrf.mxu3 }
 0x33b   : > { %v3781_v47 = vadd.f32 %v1487_v45, %v3749_v9 }
 0x33c   : > { %v1339_v48 = vpop.f32.mrf.mxu2 }
 0x33d   : > { %v1490_v49 = vmul.f32 0.044715, %v3781_v47  ;;  %v1489_v55 = vmul.f32 0.5, %v3781_v47 }
 0x33f   : > { %v1491_v50 = vmul.f32 %v1490_v49, %v3781_v47 }
 0x341   : > { %v1492_v51 = vmul.f32 %v1491_v50, %v3781_v47  ;;  %v3274_v50 = vld [vmem:[#allocation7 + $0xd8] sm:$0xff] }
 0x342   : > { %2079 = vmatpush.bf16.msra.mxu3 %v3274_v50 }
 0x343   : > { %v1493_v52 = vadd.f32 %v1492_v51, %v3781_v47  ;;  %v3273_v51 = vld [vmem:[#allocation7 + $0xd0] sm:$0xff] }
 0x345   : > { %v1494_v53 = vmul.f32 0.7978846, %v1493_v52  ;;  %v3286_v52 = vld [vmem:[#allocation2 + $0x2b8] sm:$0xff] }
 0x346   : > { %2168 = vmatpush.bf16.msrb.mxu0 %v3286_v52  ;;  %2080 = vmatpush.bf16.msra.mxu3 %v3273_v51 }
 0x347   : > { %3385 = vtanh.f32 %v1494_v53  ;;  %v3272_v53 = vld [vmem:[#allocation7 + $0xc8] sm:$0xff] }
 0x34a   : > { %2081 = vmatpush.bf16.msra.mxu3 %v3272_v53 }
 0x34d   : > { %v3386_v54 = vpop.eup %3385 }
 0x34e   : > { %v1496_v56 = vadd.f32 1.0, %v3386_v54  ;;  %v3285_v54 = vld [vmem:[#allocation2 + $0x2b0] sm:$0xff] }
 0x34f   : > { %2169 = vmatpush.bf16.msrb.mxu0 %v3285_v54 }
 0x350   : > { %v1497_v57 = vmul.f32 %v1496_v56, %v1489_v55  ;;  %v3271_v55 = vld [vmem:[#allocation7 + $0xc0] sm:$0xff]  ;;  %v3284_v56 = vld [vmem:[#allocation2 + $0x2a8] sm:$0xff] }
 0x351   : > { %2082 = vmatpush.bf16.msra.mxu3 %v3271_v55 }
 0x352   : > { %v1498_v9 = vpack.c.bf16 %v1497_v57, %v1497_v57  ;;  %v1517_v58 = vrot.slane %v1497_v57, 4  ;;  %v3283_v57 = vld [vmem:[#allocation2 + $0x2a0] sm:$0xff] }
 0x353   : > { %2170 = vmatpush.bf16.msrb.mxu0 %v3284_v56 }
 0x354   : > { %1656 = vmatmul.bf16.vlgmr.msrb.gmra.mxu2 %v1498_v9  ;;  %v2851_v61 = vpack.c.bf16 %v1517_v58, %v1517_v58  ;;  %v3282_v9 = vld [vmem:[#allocation2 + $0x298] sm:$0xff]  ;;  %v3281_v58 = vld [vmem:[#allocation2 + $0x290] sm:$0xff] }
 0x356   : > { %2852 = vmatmul.msk.bf16.vlgmr.msrb.gmra.mxu1 %vm3790_vm14, %v2851_v61  ;;  %2919 = vmatmul.msk.bf16.vlgmr.msrb.gmra.mxu3 %vm3794_vm15, %v2851_v61 }
 0x357   : > { %2171 = vmatpush.bf16.msrb.mxu0 %v3283_v57  ;;  %2261 = vmatpush.bf16.msrb.mxu1 %v3294_v19 }
 0x35b   : > { %2172 = vmatpush.bf16.msrb.mxu0 %v3282_v9  ;;  %2262 = vmatpush.bf16.msrb.mxu1 %v3293_v34 }
 0x35f   : > { %2173 = vmatpush.bf16.msrb.mxu0 %v3281_v58 }
 0x363   : > { %2174 = vmatpush.bf16.msrb.mxu0 %v3280_v59 }
 0x367   : > { %2175 = vmatpush.bf16.msrb.mxu0 %v3279_v60 }
 0x3d3   : > { %v1596_v21 = vpop.f32.mrf.mxu1 }
 0x3d7   : > { %v1657_v22 = vpop.f32.mrf.mxu2 }
 0x3d8   : > { %v1658_v24 = vadd.f32 %v1657_v22, %v1596_v21  ;;  %v3290_v21 = vld [vmem:[#allocation5 + $0x298] sm:$0xff]  ;;  %v3289_v22 = vld [vmem:[#allocation5 + $0x290] sm:$0xff] }
 0x3d9   : > { %v1736_v26 = vpop.f32.mrf.mxu3 }
 0x3da   : > { %v1740_v28 = vadd.f32 %v1736_v26, %v1658_v24 }
 0x3db   : > { %v1598_v29 = vpop.f32.mrf.mxu1 }
 0x3dc   : > { %v1746_v30 = vadd.f32 %v3372_v25, %v1740_v28  ;;  %v3287_v25 = vld [vmem:[#allocation5 + $0x280] sm:$0xff] }
 0x3de   : > { %v1748_v32 = vmul.f32 0.044715, %v1746_v30  ;;  %v1747_v43 = vmul.f32 0.5, %v1746_v30 }
 0x3df   : > { %v1659_v33 = vpop.f32.mrf.mxu2 }
 0x3e0   : > { %v1749_v35 = vmul.f32 %v1748_v32, %v1746_v30 }
 0x3e1   : > { %v1738_v36 = vpop.f32.mrf.mxu3 }
 0x3e2   : > { %v1750_v38 = vmul.f32 %v1749_v35, %v1746_v30 }
 0x3e4   : > { %v1751_v39 = vadd.f32 %v1750_v38, %v1746_v30 }
 0x3e6   : > { %v1752_v40 = vmul.f32 0.7978846, %v1751_v39 }
 0x3e8   : > { %3387 = vtanh.f32 %v1752_v40 }
 0x3ee   : > { %v3388_v41 = vpop.eup %3387 }
 0x3ef   : > { %v1754_v44 = vadd.f32 1.0, %v3388_v41 }
 0x3f1   : > { %v1755_v45 = vmul.f32 %v1754_v44, %v1747_v43  ;;  %v3374_v43 = vld [vmem:[%s3863_s9 + $0x3] ss:$0 sm:$0xff] }
 0x3f2   : > { %v3376_v44 = vld [vmem:[%s3861_s7 + $0x3] ss:$0 sm:$0xff] }
 0x3f3   : > { %v1756_v46 = vpack.c.bf16 %v1755_v45, %v1755_v45  ;;  %v1774_v48 = vrot.slane %v1755_v45, 4 }
 0x3f5   : > { %1912 = vmatmul.bf16.vlgmr.msra.gmra.mxu1 %v1756_v46  ;;  %v2954_v49 = vpack.c.bf16 %v1774_v48, %v1774_v48 }
 0x3f7   : > { %2955 = vmatmul.msk.bf16.vlgmr.msra.gmra.mxu0 %vm3790_vm14, %v2954_v49  ;;  %3022 = vmatmul.msk.bf16.vlgmr.msra.gmra.mxu2 %vm3794_vm15, %v2954_v49 }
 0x472   : > { %v1913_v61 = vpop.f32.mrf.mxu1 }
 0x474   : > { %v1852_v62 = vpop.f32.mrf.mxu0 }
 0x475   : > { %v1914_v42 = vadd.f32 %v1913_v61, %v1852_v62 }
 0x47a   : > { %v1915_v0 = vpop.f32.mrf.mxu1  ;;  %v1992_v1 = vpop.f32.mrf.mxu2 }
 0x47b   : > { %v1996_v2 = vadd.f32 %v1992_v1, %v1914_v42 }
 0x47c   : > { %v1854_v3 = vpop.f32.mrf.mxu0 }
 0x47d   : > { %v2002_v4 = vadd.f32 %v3373_v63, %v1996_v2 }
 0x47f   : > { %v2003_v5 = vadd.f32 %v2002_v4, %v3781_v47  ;;  %v3292_v47 = vld [vmem:[#allocation5 + $0x2a8] sm:$0xff] }
 0x480   : > { %2263 = vmatpush.bf16.msrb.mxu1 %v3292_v47 }
 0x481   : > { %v2004_v6 = vpack.c.bf16 %v2003_v5, %v2003_v5  ;;  %v2089_v7 = vmul.f32 0.044715, %v2003_v5  ;;  %v2088_v15 = vmul.f32 0.5, %v2003_v5 }
 0x482   : > { %v1994_v8 = vpop.f32.mrf.mxu2 }
 0x483   : > { %2083 = vmatmul.bf16.vlgmr.msra.gmra.mxu3 %v2004_v6  ;;  %v2090_v10 = vmul.f32 %v2089_v7, %v2003_v5 }
 0x484   : > { %2264 = vmatpush.bf16.msrb.mxu1 %v3291_v20 }
 0x485   : > { %v2091_v11 = vmul.f32 %v2090_v10, %v2003_v5 }
 0x487   : > { %v2092_v12 = vadd.f32 %v2091_v11, %v2003_v5 }
 0x488   : > { %2265 = vmatpush.bf16.msrb.mxu1 %v3290_v21 }
 0x489   : > { %v2093_v13 = vmul.f32 0.7978846, %v2092_v12 }
 0x48b   : > { %3389 = vtanh.f32 %v2093_v13 }
 0x48c   : > { %2266 = vmatpush.bf16.msrb.mxu1 %v3289_v22 }
 0x490   : > { %2267 = vmatpush.bf16.msrb.mxu1 %v3288_v23 }
 0x491   : > { %v3390_v14 = vpop.eup %3389 }
 0x492   : > { %v2095_v16 = vadd.f32 1.0, %v3390_v14 }
 0x494   : > { %v2096_v17 = vmul.f32 %v2095_v16, %v2088_v15  ;;  %2268 = vmatpush.bf16.msrb.mxu1 %v3287_v25 }
 0x496   : > { %v2097_v18 = vpack.c.bf16 %v2096_v17, %v2096_v17 }
 0x498   : > { %2176 = vmatmul.bf16.vlgmr.msrb.gmra.mxu0 %v2097_v18 }
 0x506   : > { %v2084_v24 = vpop.f32.mrf.mxu3 }
 0x507   : > { %v2085_v46 = vadd.f32 %v3374_v43, %v2084_v24 }
 0x50e   : > { %v2086_v26 = vpop.f32.mrf.mxu3 }
 0x515   : > { %v2177_v28 = vpop.f32.mrf.mxu0 }
 0x516   : > { %v2178_v29 = vadd.f32 %v3375_v27, %v2177_v28 }
 0x518   : > { %v2182_v30 = vmul.f32 0.044715, %v2178_v29  ;;  %v2181_v38 = vmul.f32 0.5, %v2178_v29 }
 0x51a   : > { %v2183_v31 = vmul.f32 %v2182_v30, %v2178_v29 }
 0x51c   : > { %v2184_v32 = vmul.f32 %v2183_v31, %v2178_v29 }
 0x51d   : > { %v2179_v33 = vpop.f32.mrf.mxu0 }
 0x51e   : > { %v2185_v35 = vadd.f32 %v2184_v32, %v2178_v29 }
 0x520   : > { %v2186_v36 = vmul.f32 0.7978846, %v2185_v35 }
 0x522   : > { %3391 = vtanh.f32 %v2186_v36 }
 0x528   : > { %v3392_v37 = vpop.eup %3391 }
 0x529   : > { %v2188_v39 = vadd.f32 1.0, %v3392_v37 }
 0x52b   : > { %v2189_v40 = vmul.f32 %v2188_v39, %v2181_v38 }
 0x52d   : > { %v2190_v41 = vpack.c.bf16 %v2189_v40, %v2189_v40 }
 0x52f   : > { %2269 = vmatmul.bf16.vlgmr.msrb.gmra.mxu1 %v2190_v41 }
 0x5ac   : > { %v2270_v45 = vpop.f32.mrf.mxu1 }
 0x5ad   : > { %v2271_v48 = vadd.f32 %v3376_v44, %v2270_v45 }
 0x5af   : > { %v2274_v49 = vadd.f32 %v2271_v48, %v2085_v46 }
 0x5b1   : > { %2275 = vst [vmem:[%s413_s11] sm:$0xff] %v2274_v49 }
 0x5b2   : > { %3510 = shalt.err (!%p3507_p8)
}
 0x5b3   : > { %3307 = dma.vmem_to_hbm [thread:$0]  (%p3653_p5), %s2290_s12, 128, %s2292_s18, %s2277_s17  }
 0x5b4   : > { %v2272_v50 = vpop.f32.mrf.mxu1 }
 0x5b5 PF: > { %p3329_p9 = scmp.ge.s32.totalorder %s3553_s16, 2  ;;  %s2303_s26 = sand.u32 1, %s3541_s13  }
 0x5b6   : > { %s2304_s15 = scalar_lea.sflag [#allocation4], %s2303_s26 }
 0x5b7   : > { %p3320_p10 = pnand %p3329_p9, %p3657_p6 }
 0x5b9   : > { %p3321_p11 = pneg %p3320_p10 }
 0x5bb   : > { %3536 = dma.done.wait (%p3321_p11), %s2304_s15, 128  }
 0x5bc   : > { %3538 = vsyncadd (%p3321_p11), %s2304_s15, 4294967168  ;;  %s3888_s22 = sld [smem:[#allocation12_spill]]  ;;  %p22_p12 = scmp.ge.s32.totalorder %s3640_s19, 4  }
 0x5bd   : > { %s3889_s15 = sld [smem:[#allocation13_spill]]  ;;  %s3890_s13 = smov %s3545_s14 }
 0x5be   : > { %s3892_s16 = smov %s3640_s19  ;;  %24 = sbr.rel (!%p22_p12) target bundleno = 8 (0x8), region = 137 }
 0x5c2   : > { %s3891_s14 = smov %s3888_s22 }
 0x5c3   :  { %2310 = vsyncpa [#allocation3], 1 }
 0x5c4   :  { %2312 = vsyncpa [#allocation3 + $0x1], 1 }
 0x5c5   :  { %2313 = vsyncpa [#allocation6], 1 }
 0x5c6   :  { %2314 = vsyncpa [#allocation4], 1 }
 0x5c7   :  { %2316 = vsyncpa [#allocation4 + $0x1], 1 }

</bundles_post_ra>
